<compile_context>
chip_gen: v6e
topology: v6e:2x2x1
jax: 0.10.0
libtpu: 0.0.40
codegen_flags: <defaults>
</compile_context>

<pallas_src>
import jax
import jax.numpy as jnp
from jax.experimental import pallas as pl
from jax.experimental.pallas import tpu as pltpu
from jax.scipy.special import erf as _erf_ref

_SQRT_HALF = 0.7071067811865476
_LANE = 128


def _round_up(x, m):
    return (x + m - 1) // m * m


def _gelu_x2(x):
    """2 * GELU_exact(x) = x * (1 + erf(x / sqrt(2))).

    GELU's 0.5 is folded into the conv weights at pack time.  erf via
    Abramowitz & Stegun 7.1.26 (|err| < 1.5e-7) with an EXACT divide --
    the approx EUP reciprocal broke the 1e-3 tolerance in the previous run.
    """
    a1, a2, a3, a4, a5 = (0.254829592, -0.284496736, 1.421413741,
                          -1.453152027, 1.061405429)
    p = 0.3275911
    z = x * _SQRT_HALF
    za = jnp.abs(z)
    t = 1.0 / (1.0 + p * za)
    poly = ((((a5 * t + a4) * t + a3) * t + a2) * t + a1) * t
    erf_abs = 1.0 - poly * jnp.exp(-za * za)
    erf = jnp.where(z >= 0.0, erf_abs, -erf_abs)
    return x * (1.0 + erf)


def _shift_prev(a):
    # out[:, l, :] = a[:, (l - 1) % L, :]   (circular, static slices + concat)
    return jnp.concatenate([a[:, -1:, :], a[:, :-1, :]], axis=1)


def _shift_next(a):
    # out[:, l, :] = a[:, (l + 1) % L, :]   (circular)
    return jnp.concatenate([a[:, 1:, :], a[:, :1, :]], axis=1)


def _conv3_circular(g3, w_ref, b_ref):
    """Circular k=3 Conv1d of the (Bb, L, C) activation `g3`.

    w_ref: (3, C, Cout) tap-major [l-1, l, l+1]; b_ref: (1, Cout).
    Batch is folded into the matmul M dim; the three taps are three
    accumulating (Bb*L, C) @ (C, Cout) dots (the middle tap needs no shift).
    """
    bb, length, c = g3.shape
    m = bb * length
    h = jnp.dot(_shift_prev(g3).reshape(m, c), w_ref[0],
                preferred_element_type=jnp.float32)
    h = h + jnp.dot(g3.reshape(m, c), w_ref[1],
                    preferred_element_type=jnp.float32)
    h = h + jnp.dot(_shift_next(g3).reshape(m, c), w_ref[2],
                    preferred_element_type=jnp.float32)
    return h + b_ref[...]


def _residual_block_kernel(x_ref, emb_ref,
                           w1_ref, b1_ref,
                           we_ref, be_ref,
                           w2_ref, b2_ref,
                           ws_ref, bs_ref,
                           o_ref):
    bb, length, c_in = x_ref.shape          # c_in/c_out are the 128-padded widths
    c_out = o_ref.shape[-1]
    m = bb * length

    x3 = x_ref[...].astype(jnp.float32)                                   # (bb, L, Cin)

    # Conditioning projection, once per grid step: (bb, Ccond) @ (Ccond, Cout).
    emb2 = emb_ref[...].reshape(bb, emb_ref.shape[-1]).astype(jnp.float32)
    emb_out = jnp.dot(emb2, we_ref[...],
                      preferred_element_type=jnp.float32) + be_ref[...]   # (bb, Cout)

    # h = conv1(gelu(norm1(x))), norm1 == Identity (0.5 of GELU folded in w1).
    h = _conv3_circular(_gelu_x2(x3), w1_ref, b1_ref)                     # (m, Cout)

    # h = h + cond_emb(emb)[..., None]   (broadcast over L)
    h3 = h.reshape(bb, length, c_out) + emb_out[:, None, :]

    # h = conv2(gelu(norm2(h))), norm2 == Identity (0.5 of GELU folded in w2).
    h = _conv3_circular(_gelu_x2(h3), w2_ref, b2_ref)                     # (m, Cout)

    # out = h + shortcut(x)   (1x1 conv since in_channels != out_channels)
    sc = jnp.dot(x3.reshape(m, c_in), ws_ref[...],
                 preferred_element_type=jnp.float32) + bs_ref[...]
    o_ref[...] = (h + sc).reshape(bb, length, c_out).astype(o_ref.dtype)


def pack_residual_block_params(params):
    """One-time repack of PyTorch-layout parameters for the channels-last
    kernel (transpose, pad to 128 lanes, tap split, GELU-0.5 fold).  Pure
    function of the constant parameters -> do it once, not per forward call."""
    c_out, c_in, _k = params["w1"].shape
    c_cond = params["we"].shape[1]
    c_pi = _round_up(c_in, _LANE)
    c_po = _round_up(c_out, _LANE)
    c_pc = _round_up(c_cond, _LANE)
    f32 = jnp.float32

    def conv3(w, ci, ci_p):
        # PyTorch (Cout, Cin, 3) -> tap-major (3, ci_p, c_po); x0.5 folds GELU's 0.5.
        w = jnp.transpose(w.astype(f32), (2, 1, 0))                       # (3, Cin, Cout)
        return 0.5 * jnp.pad(w, ((0, 0), (0, ci_p - ci), (0, c_po - c_out)))

    def mat(a, rows, rows_p):
        a = a.astype(f32)
        return jnp.pad(a, ((0, rows_p - rows), (0, c_po - c_out)))

    def bias(b):
        return jnp.pad(b.astype(f32).reshape(1, -1), ((0, 0), (0, c_po - c_out)))

    packed = {
        "w1": conv3(params["w1"], c_in, c_pi),
        "b1": bias(params["b1"]),
        "we": mat(params["we"].T, c_cond, c_pc),
        "be": bias(params["be"]),
        "w2": conv3(params["w2"], c_out, c_po),
        "b2": bias(params["b2"]),
        "ws": mat(params["ws"][:, :, 0].T, c_in, c_pi),
        "bs": bias(params["bs"]),
    }
    meta = {"c_in": c_in, "c_out": c_out, "c_cond": c_cond,
            "c_pi": c_pi, "c_po": c_po, "c_pc": c_pc}
    return packed, meta


def residual_block_forward(x_ncl, emb, packed, meta, *, batch_block=None):
    """x_ncl: (B, C_in, L) float32 (PyTorch NCL); emb: (B, C_cond)."""
    B, c_in, L = x_ncl.shape
    assert c_in == meta["c_in"] and emb.shape[1] == meta["c_cond"]
    assert L % 8 == 0
    c_pi, c_po, c_pc = meta["c_pi"], meta["c_po"], meta["c_pc"]

    if batch_block is None:
        # >= 2 grid steps so ("parallel",) can feed both v7x TensorCores.
        batch_block = B // 2 if (B >= 2 and B % 2 == 0) else B
    assert B % batch_block == 0

    f32 = jnp.float32
    # NCL -> channels-last, pad channels to 128 lanes.  At real scale keep the
    # surrounding model NLC end-to-end so this HBM round trip disappears.
    x_nlc = jnp.transpose(x_ncl, (0, 2, 1)).astype(f32)                   # (B, L, Cin)
    x_p = jnp.pad(x_nlc, ((0, 0), (0, 0), (0, c_pi - c_in)))              # (B, L, c_pi)
    emb_p = jnp.pad(emb.astype(f32),
                    ((0, 0), (0, c_pc - emb.shape[1])))[:, None, :]       # (B, 1, c_pc)

    def const_spec(shape):
        zeros = (0,) * len(shape)
        return pl.BlockSpec(shape, lambda i, _z=zeros: _z)

    out_p = pl.pallas_call(
        _residual_block_kernel,
        out_shape=jax.ShapeDtypeStruct((B, L, c_po), f32),
        grid=(B // batch_block,),
        in_specs=[
            pl.BlockSpec((batch_block, L, c_pi), lambda i: (i, 0, 0)),    # x
            pl.BlockSpec((batch_block, 1, c_pc), lambda i: (i, 0, 0)),    # emb
            const_spec((3, c_pi, c_po)), const_spec((1, c_po)),           # conv1
            const_spec((c_pc, c_po)), const_spec((1, c_po)),              # cond_emb
            const_spec((3, c_po, c_po)), const_spec((1, c_po)),           # conv2
            const_spec((c_pi, c_po)), const_spec((1, c_po)),              # shortcut 1x1
        ],
        out_specs=pl.BlockSpec((batch_block, L, c_po), lambda i: (i, 0, 0)),
        compiler_params=pltpu.CompilerParams(
            dimension_semantics=("parallel",),          # megacore sharding on v7x
            vmem_limit_bytes=32 * 1024 * 1024),         # explicit; safe on 64MiB v7x
    )(x_p, emb_p, packed["w1"], packed["b1"], packed["we"], packed["be"],
      packed["w2"], packed["b2"], packed["ws"], packed["bs"])

    # Drop channel padding, back to PyTorch NCL.
    return jnp.transpose(out_p[:, :, :meta["c_out"]], (0, 2, 1))


def _ref_forward(x_ncl, emb, params):
    # Pure-JAX reference mirroring the PyTorch module (NCL layout).
    gelu = lambda v: 0.5 * v * (1.0 + _erf_ref(v * _SQRT_HALF))

    def circ_conv(v, w, b):                                               # v (B,C,L)
        vp = jnp.pad(v, ((0, 0), (0, 0), (1, 1)), mode="wrap")
        out = jax.lax.conv_general_dilated(
            vp, w, window_strides=(1,), padding="VALID",
            dimension_numbers=("NCH", "OIH", "NCH"))
        return out + b[None, :, None]

    h = circ_conv(gelu(x_ncl), params["w1"], params["b1"])
    emb_out = emb @ params["we"].T + params["be"]
    h = h + emb_out[:, :, None]
    h = circ_conv(gelu(h), params["w2"], params["b2"])
    sc = jnp.einsum("bcl,oc->bol", x_ncl, params["ws"][:, :, 0]) \
        + params["bs"][None, :, None]
    return h + sc


if __name__ == "__main__":
    B, C_in, C_out, C_cond, L = 2, 4, 8, 6, 16

    key = jax.random.PRNGKey(0)
    ks = jax.random.split(key, 10)
    # Shapes follow the module's __init__ (Conv1d weight = (Cout, Cin, K), etc.).
    # NOTE: PyTorch's zero_module() zeroes conv2's parameters at init; we use
    # nonzero deterministic values so the full compute path is exercised.
    params = {
        "w1": 0.2 * jax.random.normal(ks[0], (C_out, C_in, 3), jnp.float32),
        "b1": 0.1 * jax.random.normal(ks[1], (C_out,), jnp.float32),
        "we": 0.2 * jax.random.normal(ks[2], (C_out, C_cond), jnp.float32),
        "be": 0.1 * jax.random.normal(ks[3], (C_out,), jnp.float32),
        "w2": 0.2 * jax.random.normal(ks[4], (C_out, C_out, 3), jnp.float32),
        "b2": 0.1 * jax.random.normal(ks[5], (C_out,), jnp.float32),
        "ws": 0.2 * jax.random.normal(ks[6], (C_out, C_in, 1), jnp.float32),
        "bs": 0.1 * jax.random.normal(ks[7], (C_out,), jnp.float32),
    }
    x = jax.random.normal(ks[8], (B, C_in, L), jnp.float32)               # NCL like PyTorch
    emb = jax.random.normal(ks[9], (B, C_cond), jnp.float32)

    packed, meta = pack_residual_block_params(params)   # one-time weight repack
    out = residual_block_forward(x, emb, packed, meta)
    out = jax.block_until_ready(out)

    ref = _ref_forward(x, emb, params)
    assert out.shape == (B, C_out, L), out.shape
    max_err = float(jnp.max(jnp.abs(out - ref)))
    assert jnp.allclose(out, ref, rtol=1e-3, atol=1e-3), max_err
    print("KERNEL_OK")
</pallas_src>

<mosaic_0001>
module attributes {stable_mosaic.version = 11 : i64} {
  func.func @_residual_block_kernel(%arg0: i32, %arg1: memref<1x16x128xf32, #tpu.memory_space<vmem>>, %arg2: memref<1x1x128xf32, #tpu.memory_space<vmem>>, %arg3: memref<3x128x128xf32, #tpu.memory_space<vmem>>, %arg4: memref<1x128xf32, #tpu.memory_space<vmem>>, %arg5: memref<128x128xf32, #tpu.memory_space<vmem>>, %arg6: memref<1x128xf32, #tpu.memory_space<vmem>>, %arg7: memref<3x128x128xf32, #tpu.memory_space<vmem>>, %arg8: memref<1x128xf32, #tpu.memory_space<vmem>>, %arg9: memref<128x128xf32, #tpu.memory_space<vmem>>, %arg10: memref<1x128xf32, #tpu.memory_space<vmem>>, %arg11: memref<1x16x128xf32, #tpu.memory_space<vmem>>) attributes {dimension_semantics = [#tpu.dimension_semantics<parallel>], iteration_bounds = array<i64: 2>, scalar_prefetch = 0 : i64, scratch_operands = 0 : i64, tpu.core_type = #tpu.core_type<tc>, window_params = [{transform_indices = @transform_0, window_bounds = array<i64: 1, 16, 128>}, {transform_indices = @transform_1, window_bounds = array<i64: 1, 1, 128>}, {pipeline_mode = #tpu.pipeline_mode<synchronous>, transform_indices = @transform_2, window_bounds = array<i64: 3, 128, 128>}, {pipeline_mode = #tpu.pipeline_mode<synchronous>, transform_indices = @transform_3, window_bounds = array<i64: 1, 128>}, {pipeline_mode = #tpu.pipeline_mode<synchronous>, transform_indices = @transform_4, window_bounds = array<i64: 128, 128>}, {pipeline_mode = #tpu.pipeline_mode<synchronous>, transform_indices = @transform_5, window_bounds = array<i64: 1, 128>}, {pipeline_mode = #tpu.pipeline_mode<synchronous>, transform_indices = @transform_6, window_bounds = array<i64: 3, 128, 128>}, {pipeline_mode = #tpu.pipeline_mode<synchronous>, transform_indices = @transform_7, window_bounds = array<i64: 1, 128>}, {pipeline_mode = #tpu.pipeline_mode<synchronous>, transform_indices = @transform_8, window_bounds = array<i64: 128, 128>}, {pipeline_mode = #tpu.pipeline_mode<synchronous>, transform_indices = @transform_9, window_bounds = array<i64: 1, 128>}, {transform_indices = @transform_10, window_bounds = array<i64: 1, 16, 128>}]} {
    %c0 = arith.constant 0 : index
    %c0_0 = arith.constant 0 : index
    %c0_1 = arith.constant 0 : index
    %0 = vector.load %arg1[%c0, %c0_0, %c0_1] : memref<1x16x128xf32, #tpu.memory_space<vmem>>, vector<1x16x128xf32>
    %c0_2 = arith.constant 0 : index
    %c0_3 = arith.constant 0 : index
    %c0_4 = arith.constant 0 : index
    %1 = vector.load %arg2[%c0_2, %c0_3, %c0_4] : memref<1x1x128xf32, #tpu.memory_space<vmem>>, vector<1x1x128xf32>
    %2 = vector.shape_cast %1 : vector<1x1x128xf32> to vector<1x128xf32>
    %c0_5 = arith.constant 0 : index
    %c0_6 = arith.constant 0 : index
    %3 = vector.load %arg5[%c0_5, %c0_6] : memref<128x128xf32, #tpu.memory_space<vmem>>, vector<128x128xf32>
    %cst = arith.constant dense<0.000000e+00> : vector<1x128xf32>
    %4 = tpu.matmul %2, %3, %cst {dimension_numbers = #tpu.dot_dimension_numbers<[1], [0], [0], [1], [0, 0, 1, 1], [], []>} : vector<1x128xf32>, vector<128x128xf32>, vector<1x128xf32> -> vector<1x128xf32>
    %c0_7 = arith.constant 0 : index
    %c0_8 = arith.constant 0 : index
    %5 = vector.load %arg6[%c0_7, %c0_8] : memref<1x128xf32, #tpu.memory_space<vmem>>, vector<1x128xf32>
    %6 = arith.addf %4, %5 : vector<1x128xf32>
    %cst_9 = arith.constant 0.707106769 : f32
    %7 = vector.broadcast %cst_9 : f32 to vector<1x16x128xf32>
    %8 = arith.mulf %0, %7 : vector<1x16x128xf32>
    %9 = math.absf %8 : vector<1x16x128xf32>
    %cst_10 = arith.constant 0.327591091 : f32
    %10 = vector.broadcast %cst_10 : f32 to vector<1x16x128xf32>
    %11 = arith.mulf %10, %9 : vector<1x16x128xf32>
    %cst_11 = arith.constant 1.000000e+00 : f32
    %12 = vector.broadcast %cst_11 : f32 to vector<1x16x128xf32>
    %13 = arith.addf %12, %11 : vector<1x16x128xf32>
    %cst_12 = arith.constant 1.000000e+00 : f32
    %14 = vector.broadcast %cst_12 : f32 to vector<1x16x128xf32>
    %15 = arith.divf %14, %13 : vector<1x16x128xf32>
    %cst_13 = arith.constant 1.06140542 : f32
    %16 = vector.broadcast %cst_13 : f32 to vector<1x16x128xf32>
    %17 = arith.mulf %16, %15 : vector<1x16x128xf32>
    %cst_14 = arith.constant -1.45315206 : f32
    %18 = vector.broadcast %cst_14 : f32 to vector<1x16x128xf32>
    %19 = arith.addf %17, %18 : vector<1x16x128xf32>
    %20 = arith.mulf %19, %15 : vector<1x16x128xf32>
    %cst_15 = arith.constant 1.42141378 : f32
    %21 = vector.broadcast %cst_15 : f32 to vector<1x16x128xf32>
    %22 = arith.addf %20, %21 : vector<1x16x128xf32>
    %23 = arith.mulf %22, %15 : vector<1x16x128xf32>
    %cst_16 = arith.constant -0.284496725 : f32
    %24 = vector.broadcast %cst_16 : f32 to vector<1x16x128xf32>
    %25 = arith.addf %23, %24 : vector<1x16x128xf32>
    %26 = arith.mulf %25, %15 : vector<1x16x128xf32>
    %cst_17 = arith.constant 0.254829586 : f32
    %27 = vector.broadcast %cst_17 : f32 to vector<1x16x128xf32>
    %28 = arith.addf %26, %27 : vector<1x16x128xf32>
    %29 = arith.mulf %28, %15 : vector<1x16x128xf32>
    %cst_18 = arith.constant 0.000000e+00 : f32
    %30 = vector.broadcast %cst_18 : f32 to vector<1x16x128xf32>
    %31 = arith.subf %30, %9 : vector<1x16x128xf32>
    %32 = arith.mulf %31, %9 : vector<1x16x128xf32>
    %33 = math.exp %32 : vector<1x16x128xf32>
    %34 = arith.mulf %29, %33 : vector<1x16x128xf32>
    %cst_19 = arith.constant 1.000000e+00 : f32
    %35 = vector.broadcast %cst_19 : f32 to vector<1x16x128xf32>
    %36 = arith.subf %35, %34 : vector<1x16x128xf32>
    %cst_20 = arith.constant 0.000000e+00 : f32
    %37 = vector.broadcast %cst_20 : f32 to vector<1x16x128xf32>
    %38 = arith.cmpf oge, %8, %37 : vector<1x16x128xf32>
    %cst_21 = arith.constant 0.000000e+00 : f32
    %39 = vector.broadcast %cst_21 : f32 to vector<1x16x128xf32>
    %40 = arith.subf %39, %36 : vector<1x16x128xf32>
    %41 = arith.select %38, %36, %40 : vector<1x16x128xi1>, vector<1x16x128xf32>
    %cst_22 = arith.constant 1.000000e+00 : f32
    %42 = vector.broadcast %cst_22 : f32 to vector<1x16x128xf32>
    %43 = arith.addf %42, %41 : vector<1x16x128xf32>
    %44 = arith.mulf %0, %43 : vector<1x16x128xf32>
    %45 = vector.extract_strided_slice %44 {offsets = [0, 15, 0], sizes = [1, 1, 128], strides = [1, 1, 1]} : vector<1x16x128xf32> to vector<1x1x128xf32>
    %46 = vector.extract_strided_slice %44 {offsets = [0, 0, 0], sizes = [1, 15, 128], strides = [1, 1, 1]} : vector<1x16x128xf32> to vector<1x15x128xf32>
    %47 = tpu.concatenate %45, %46 in 1 : vector<1x1x128xf32>, vector<1x15x128xf32> -> vector<1x16x128xf32>
    %48 = vector.shape_cast %47 : vector<1x16x128xf32> to vector<16x128xf32>
    %c0_23 = arith.constant 0 : index
    %c0_24 = arith.constant 0 : index
    %c0_25 = arith.constant 0 : index
    %49 = vector.load %arg3[%c0_23, %c0_24, %c0_25] : memref<3x128x128xf32, #tpu.memory_space<vmem>>, vector<1x128x128xf32>
    %50 = vector.shape_cast %49 : vector<1x128x128xf32> to vector<128x128xf32>
    %cst_26 = arith.constant dense<0.000000e+00> : vector<16x128xf32>
    %51 = tpu.matmul %48, %50, %cst_26 {dimension_numbers = #tpu.dot_dimension_numbers<[1], [0], [0], [1], [0, 0, 1, 1], [], []>} : vector<16x128xf32>, vector<128x128xf32>, vector<16x128xf32> -> vector<16x128xf32>
    %52 = vector.shape_cast %44 : vector<1x16x128xf32> to vector<16x128xf32>
    %c1 = arith.constant 1 : index
    %c0_27 = arith.constant 0 : index
    %c0_28 = arith.constant 0 : index
    %53 = vector.load %arg3[%c1, %c0_27, %c0_28] : memref<3x128x128xf32, #tpu.memory_space<vmem>>, vector<1x128x128xf32>
    %54 = vector.shape_cast %53 : vector<1x128x128xf32> to vector<128x128xf32>
    %cst_29 = arith.constant dense<0.000000e+00> : vector<16x128xf32>
    %55 = tpu.matmul %52, %54, %cst_29 {dimension_numbers = #tpu.dot_dimension_numbers<[1], [0], [0], [1], [0, 0, 1, 1], [], []>} : vector<16x128xf32>, vector<128x128xf32>, vector<16x128xf32> -> vector<16x128xf32>
    %56 = arith.addf %51, %55 : vector<16x128xf32>
    %57 = vector.extract_strided_slice %44 {offsets = [0, 1, 0], sizes = [1, 15, 128], strides = [1, 1, 1]} : vector<1x16x128xf32> to vector<1x15x128xf32>
    %58 = vector.extract_strided_slice %44 {offsets = [0, 0, 0], sizes = [1, 1, 128], strides = [1, 1, 1]} : vector<1x16x128xf32> to vector<1x1x128xf32>
    %59 = tpu.concatenate %57, %58 in 1 : vector<1x15x128xf32>, vector<1x1x128xf32> -> vector<1x16x128xf32>
    %60 = vector.shape_cast %59 : vector<1x16x128xf32> to vector<16x128xf32>
    %c2 = arith.constant 2 : index
    %c0_30 = arith.constant 0 : index
    %c0_31 = arith.constant 0 : index
    %61 = vector.load %arg3[%c2, %c0_30, %c0_31] : memref<3x128x128xf32, #tpu.memory_space<vmem>>, vector<1x128x128xf32>
    %62 = vector.shape_cast %61 : vector<1x128x128xf32> to vector<128x128xf32>
    %cst_32 = arith.constant dense<0.000000e+00> : vector<16x128xf32>
    %63 = tpu.matmul %60, %62, %cst_32 {dimension_numbers = #tpu.dot_dimension_numbers<[1], [0], [0], [1], [0, 0, 1, 1], [], []>} : vector<16x128xf32>, vector<128x128xf32>, vector<16x128xf32> -> vector<16x128xf32>
    %64 = arith.addf %56, %63 : vector<16x128xf32>
    %c0_33 = arith.constant 0 : index
    %c0_34 = arith.constant 0 : index
    %65 = vector.load %arg4[%c0_33, %c0_34] : memref<1x128xf32, #tpu.memory_space<vmem>>, vector<1x128xf32>
    %66 = vector.broadcast %65 : vector<1x128xf32> to vector<16x128xf32>
    %67 = arith.addf %64, %66 : vector<16x128xf32>
    %68 = vector.shape_cast %67 : vector<16x128xf32> to vector<1x16x128xf32>
    %69 = vector.shape_cast %6 : vector<1x128xf32> to vector<1x1x128xf32>
    %70 = vector.broadcast %69 : vector<1x1x128xf32> to vector<1x16x128xf32>
    %71 = arith.addf %68, %70 : vector<1x16x128xf32>
    %cst_35 = arith.constant 0.707106769 : f32
    %72 = vector.broadcast %cst_35 : f32 to vector<1x16x128xf32>
    %73 = arith.mulf %71, %72 : vector<1x16x128xf32>
    %74 = math.absf %73 : vector<1x16x128xf32>
    %cst_36 = arith.constant 0.327591091 : f32
    %75 = vector.broadcast %cst_36 : f32 to vector<1x16x128xf32>
    %76 = arith.mulf %75, %74 : vector<1x16x128xf32>
    %cst_37 = arith.constant 1.000000e+00 : f32
    %77 = vector.broadcast %cst_37 : f32 to vector<1x16x128xf32>
    %78 = arith.addf %77, %76 : vector<1x16x128xf32>
    %cst_38 = arith.constant 1.000000e+00 : f32
    %79 = vector.broadcast %cst_38 : f32 to vector<1x16x128xf32>
    %80 = arith.divf %79, %78 : vector<1x16x128xf32>
    %cst_39 = arith.constant 1.06140542 : f32
    %81 = vector.broadcast %cst_39 : f32 to vector<1x16x128xf32>
    %82 = arith.mulf %81, %80 : vector<1x16x128xf32>
    %cst_40 = arith.constant -1.45315206 : f32
    %83 = vector.broadcast %cst_40 : f32 to vector<1x16x128xf32>
    %84 = arith.addf %82, %83 : vector<1x16x128xf32>
    %85 = arith.mulf %84, %80 : vector<1x16x128xf32>
    %cst_41 = arith.constant 1.42141378 : f32
    %86 = vector.broadcast %cst_41 : f32 to vector<1x16x128xf32>
    %87 = arith.addf %85, %86 : vector<1x16x128xf32>
    %88 = arith.mulf %87, %80 : vector<1x16x128xf32>
    %cst_42 = arith.constant -0.284496725 : f32
    %89 = vector.broadcast %cst_42 : f32 to vector<1x16x128xf32>
    %90 = arith.addf %88, %89 : vector<1x16x128xf32>
    %91 = arith.mulf %90, %80 : vector<1x16x128xf32>
    %cst_43 = arith.constant 0.254829586 : f32
    %92 = vector.broadcast %cst_43 : f32 to vector<1x16x128xf32>
    %93 = arith.addf %91, %92 : vector<1x16x128xf32>
    %94 = arith.mulf %93, %80 : vector<1x16x128xf32>
    %cst_44 = arith.constant 0.000000e+00 : f32
    %95 = vector.broadcast %cst_44 : f32 to vector<1x16x128xf32>
    %96 = arith.subf %95, %74 : vector<1x16x128xf32>
    %97 = arith.mulf %96, %74 : vector<1x16x128xf32>
    %98 = math.exp %97 : vector<1x16x128xf32>
    %99 = arith.mulf %94, %98 : vector<1x16x128xf32>
    %cst_45 = arith.constant 1.000000e+00 : f32
    %100 = vector.broadcast %cst_45 : f32 to vector<1x16x128xf32>
    %101 = arith.subf %100, %99 : vector<1x16x128xf32>
    %cst_46 = arith.constant 0.000000e+00 : f32
    %102 = vector.broadcast %cst_46 : f32 to vector<1x16x128xf32>
    %103 = arith.cmpf oge, %73, %102 : vector<1x16x128xf32>
    %cst_47 = arith.constant 0.000000e+00 : f32
    %104 = vector.broadcast %cst_47 : f32 to vector<1x16x128xf32>
    %105 = arith.subf %104, %101 : vector<1x16x128xf32>
    %106 = arith.select %103, %101, %105 : vector<1x16x128xi1>, vector<1x16x128xf32>
    %cst_48 = arith.constant 1.000000e+00 : f32
    %107 = vector.broadcast %cst_48 : f32 to vector<1x16x128xf32>
    %108 = arith.addf %107, %106 : vector<1x16x128xf32>
    %109 = arith.mulf %71, %108 : vector<1x16x128xf32>
    %110 = vector.extract_strided_slice %109 {offsets = [0, 15, 0], sizes = [1, 1, 128], strides = [1, 1, 1]} : vector<1x16x128xf32> to vector<1x1x128xf32>
    %111 = vector.extract_strided_slice %109 {offsets = [0, 0, 0], sizes = [1, 15, 128], strides = [1, 1, 1]} : vector<1x16x128xf32> to vector<1x15x128xf32>
    %112 = tpu.concatenate %110, %111 in 1 : vector<1x1x128xf32>, vector<1x15x128xf32> -> vector<1x16x128xf32>
    %113 = vector.shape_cast %112 : vector<1x16x128xf32> to vector<16x128xf32>
    %c0_49 = arith.constant 0 : index
    %c0_50 = arith.constant 0 : index
    %c0_51 = arith.constant 0 : index
    %114 = vector.load %arg7[%c0_49, %c0_50, %c0_51] : memref<3x128x128xf32, #tpu.memory_space<vmem>>, vector<1x128x128xf32>
    %115 = vector.shape_cast %114 : vector<1x128x128xf32> to vector<128x128xf32>
    %cst_52 = arith.constant dense<0.000000e+00> : vector<16x128xf32>
    %116 = tpu.matmul %113, %115, %cst_52 {dimension_numbers = #tpu.dot_dimension_numbers<[1], [0], [0], [1], [0, 0, 1, 1], [], []>} : vector<16x128xf32>, vector<128x128xf32>, vector<16x128xf32> -> vector<16x128xf32>
    %117 = vector.shape_cast %109 : vector<1x16x128xf32> to vector<16x128xf32>
    %c1_53 = arith.constant 1 : index
    %c0_54 = arith.constant 0 : index
    %c0_55 = arith.constant 0 : index
    %118 = vector.load %arg7[%c1_53, %c0_54, %c0_55] : memref<3x128x128xf32, #tpu.memory_space<vmem>>, vector<1x128x128xf32>
    %119 = vector.shape_cast %118 : vector<1x128x128xf32> to vector<128x128xf32>
    %cst_56 = arith.constant dense<0.000000e+00> : vector<16x128xf32>
    %120 = tpu.matmul %117, %119, %cst_56 {dimension_numbers = #tpu.dot_dimension_numbers<[1], [0], [0], [1], [0, 0, 1, 1], [], []>} : vector<16x128xf32>, vector<128x128xf32>, vector<16x128xf32> -> vector<16x128xf32>
    %121 = arith.addf %116, %120 : vector<16x128xf32>
    %122 = vector.extract_strided_slice %109 {offsets = [0, 1, 0], sizes = [1, 15, 128], strides = [1, 1, 1]} : vector<1x16x128xf32> to vector<1x15x128xf32>
    %123 = vector.extract_strided_slice %109 {offsets = [0, 0, 0], sizes = [1, 1, 128], strides = [1, 1, 1]} : vector<1x16x128xf32> to vector<1x1x128xf32>
    %124 = tpu.concatenate %122, %123 in 1 : vector<1x15x128xf32>, vector<1x1x128xf32> -> vector<1x16x128xf32>
    %125 = vector.shape_cast %124 : vector<1x16x128xf32> to vector<16x128xf32>
    %c2_57 = arith.constant 2 : index
    %c0_58 = arith.constant 0 : index
    %c0_59 = arith.constant 0 : index
    %126 = vector.load %arg7[%c2_57, %c0_58, %c0_59] : memref<3x128x128xf32, #tpu.memory_space<vmem>>, vector<1x128x128xf32>
    %127 = vector.shape_cast %126 : vector<1x128x128xf32> to vector<128x128xf32>
    %cst_60 = arith.constant dense<0.000000e+00> : vector<16x128xf32>
    %128 = tpu.matmul %125, %127, %cst_60 {dimension_numbers = #tpu.dot_dimension_numbers<[1], [0], [0], [1], [0, 0, 1, 1], [], []>} : vector<16x128xf32>, vector<128x128xf32>, vector<16x128xf32> -> vector<16x128xf32>
    %129 = arith.addf %121, %128 : vector<16x128xf32>
    %c0_61 = arith.constant 0 : index
    %c0_62 = arith.constant 0 : index
    %130 = vector.load %arg8[%c0_61, %c0_62] : memref<1x128xf32, #tpu.memory_space<vmem>>, vector<1x128xf32>
    %131 = vector.broadcast %130 : vector<1x128xf32> to vector<16x128xf32>
    %132 = arith.addf %129, %131 : vector<16x128xf32>
    %133 = vector.shape_cast %0 : vector<1x16x128xf32> to vector<16x128xf32>
    %c0_63 = arith.constant 0 : index
    %c0_64 = arith.constant 0 : index
    %134 = vector.load %arg9[%c0_63, %c0_64] : memref<128x128xf32, #tpu.memory_space<vmem>>, vector<128x128xf32>
    %cst_65 = arith.constant dense<0.000000e+00> : vector<16x128xf32>
    %135 = tpu.matmul %133, %134, %cst_65 {dimension_numbers = #tpu.dot_dimension_numbers<[1], [0], [0], [1], [0, 0, 1, 1], [], []>} : vector<16x128xf32>, vector<128x128xf32>, vector<16x128xf32> -> vector<16x128xf32>
    %c0_66 = arith.constant 0 : index
    %c0_67 = arith.constant 0 : index
    %136 = vector.load %arg10[%c0_66, %c0_67] : memref<1x128xf32, #tpu.memory_space<vmem>>, vector<1x128xf32>
    %137 = vector.broadcast %136 : vector<1x128xf32> to vector<16x128xf32>
    %138 = arith.addf %135, %137 : vector<16x128xf32>
    %139 = arith.addf %132, %138 : vector<16x128xf32>
    %140 = vector.shape_cast %139 : vector<16x128xf32> to vector<1x16x128xf32>
    %c0_68 = arith.constant 0 : index
    %c0_69 = arith.constant 0 : index
    %c0_70 = arith.constant 0 : index
    %141 = vector.load %arg11[%c0_68, %c0_69, %c0_70] : memref<1x16x128xf32, #tpu.memory_space<vmem>>, vector<1x16x128xf32>
    tpu.vector_store %arg11[%c0_68, %c0_69, %c0_70], %140 {strides = array<i32>} : memref<1x16x128xf32, #tpu.memory_space<vmem>>, vector<1x16x128xf32>,
    return
  }
  func.func @transform_0(%arg0: i32) -> (i32, i32, i32) {
    %c0_i32 = arith.constant 0 : i32
    %c0_i32_0 = arith.constant 0 : i32
    %c0_i32_1 = arith.constant 0 : i32
    return %arg0, %c0_i32, %c0_i32_0 : i32, i32, i32
  }
  func.func @transform_1(%arg0: i32) -> (i32, i32, i32) {
    %c0_i32 = arith.constant 0 : i32
    %c0_i32_0 = arith.constant 0 : i32
    %c0_i32_1 = arith.constant 0 : i32
    return %arg0, %c0_i32, %c0_i32_0 : i32, i32, i32
  }
  func.func @transform_2(%arg0: i32) -> (i32, i32, i32) {
    %c0_i32 = arith.constant 0 : i32
    %c0_i32_0 = arith.constant 0 : i32
    %c0_i32_1 = arith.constant 0 : i32
    %c0_i32_2 = arith.constant 0 : i32
    return %c0_i32, %c0_i32_0, %c0_i32_1 : i32, i32, i32
  }
  func.func @transform_3(%arg0: i32) -> (i32, i32) {
    %c0_i32 = arith.constant 0 : i32
    %c0_i32_0 = arith.constant 0 : i32
    %c0_i32_1 = arith.constant 0 : i32
    return %c0_i32, %c0_i32_0 : i32, i32
  }
  func.func @transform_4(%arg0: i32) -> (i32, i32) {
    %c0_i32 = arith.constant 0 : i32
    %c0_i32_0 = arith.constant 0 : i32
    %c0_i32_1 = arith.constant 0 : i32
    return %c0_i32, %c0_i32_0 : i32, i32
  }
  func.func @transform_5(%arg0: i32) -> (i32, i32) {
    %c0_i32 = arith.constant 0 : i32
    %c0_i32_0 = arith.constant 0 : i32
    %c0_i32_1 = arith.constant 0 : i32
    return %c0_i32, %c0_i32_0 : i32, i32
  }
  func.func @transform_6(%arg0: i32) -> (i32, i32, i32) {
    %c0_i32 = arith.constant 0 : i32
    %c0_i32_0 = arith.constant 0 : i32
    %c0_i32_1 = arith.constant 0 : i32
    %c0_i32_2 = arith.constant 0 : i32
    return %c0_i32, %c0_i32_0, %c0_i32_1 : i32, i32, i32
  }
  func.func @transform_7(%arg0: i32) -> (i32, i32) {
    %c0_i32 = arith.constant 0 : i32
    %c0_i32_0 = arith.constant 0 : i32
    %c0_i32_1 = arith.constant 0 : i32
    return %c0_i32, %c0_i32_0 : i32, i32
  }
  func.func @transform_8(%arg0: i32) -> (i32, i32) {
    %c0_i32 = arith.constant 0 : i32
    %c0_i32_0 = arith.constant 0 : i32
    %c0_i32_1 = arith.constant 0 : i32
    return %c0_i32, %c0_i32_0 : i32, i32
  }
  func.func @transform_9(%arg0: i32) -> (i32, i32) {
    %c0_i32 = arith.constant 0 : i32
    %c0_i32_0 = arith.constant 0 : i32
    %c0_i32_1 = arith.constant 0 : i32
    return %c0_i32, %c0_i32_0 : i32, i32
  }
  func.func @transform_10(%arg0: i32) -> (i32, i32, i32) {
    %c0_i32 = arith.constant 0 : i32
    %c0_i32_0 = arith.constant 0 : i32
    %c0_i32_1 = arith.constant 0 : i32
    return %arg0, %c0_i32, %c0_i32_0 : i32, i32, i32
  }
}

</mosaic_0001>

<bundles_post_ra>
// kernel: tpu_custom_call.1
= control target key start
LH: loop header
LB: loop body
LE: loop exit
PB: predicated region body
PF: predicated region fallthrough
CT: control target
= control target key end

     0   :  { %s2757_s0 = inlined_call_operand.hbm [shape: f32[2,16,128], index: 0, kind: input, shape index: {}]   ;;  %s2758_s1 = inlined_call_operand.hbm [shape: f32[2,1,128], index: 1, kind: input, shape index: {}]   ;;  %s2759_s2 = inlined_call_operand.hbm [shape: f32[3,128,128], index: 2, kind: input, shape index: {}]   ;;  %s2760_s3 = inlined_call_operand.vmem [shape: f32[1,128], index: 3, kind: input, shape index: {}]   ;;  %s2761_s4 = inlined_call_operand.hbm [shape: f32[128,128], index: 4, kind: input, shape index: {}]   ;;  %s2762_s5 = inlined_call_operand.vmem [shape: f32[1,128], index: 5, kind: input, shape index: {}]   ;;  %s2763_s6 = inlined_call_operand.hbm [shape: f32[3,128,128], index: 6, kind: input, shape index: {}]   ;;  %s2764_s7 = inlined_call_operand.vmem [shape: f32[1,128], index: 7, kind: input, shape index: {}]   ;;  %s2765_s8 = inlined_call_operand.hbm [shape: f32[128,128], index: 8, kind: input, shape index: {}]   ;;  %s2766_s9 = inlined_call_operand.vmem [shape: f32[1,128], index: 9, kind: input, shape index: {}]   ;;  %s2767_s10 = inlined_call_operand.hbm [shape: f32[2,16,128], index: 10, kind: output, shape index: {}]  }
   0x1   :  { %2778 = sst [smem:[#allocation24_spill]] %s2757_s0 }
   0x2   :  { %2779 = sst [smem:[#allocation25_spill]] %s2759_s2 }
   0x3   :  { %2780 = sst [smem:[#allocation26_spill]] %s2761_s4 }
   0x4   :  { %2781 = sst [smem:[#allocation27_spill]] %s2763_s6 }
   0x5   :  { %2782 = sst [smem:[#allocation28_spill]] %s2765_s8 }
   0x6   :  { %15 = vsyncpa [#allocation3], 0 }
   0x7   :  { %17 = vsyncpa [#allocation3 + $0x1], 0 }
   0x8   :  { %18 = vsyncpa [#allocation6], 0 }
   0x9   :  { %20 = vsyncpa [#allocation6 + $0x1], 0 }
   0xa   :  { %21 = vsyncpa [#allocation9], 0 }
   0xb   :  { %22 = vsyncpa [#allocation12], 0 }
   0xc   :  { %23 = vsyncpa [#allocation4], 0 }
   0xd   :  { %25 = vsyncpa [#allocation4 + $0x1], 0  ;;  %s2398_s13 = smov 0   ;;  %s2400_s14 = smov 0  }
   0xe   :  { %s2402_s15 = smov 0   ;;  %s2404_s16 = smov 0  }
   0xf LB: > { %2783 = sst [smem:[#allocation20_spill]] %s2324_s15  ;;  %s2419_s17 = sadd.s32 4294967295, %s2328_s16   ;;  %s2328_s16 = sphi %s2404_s16, %s2814_s16   ;;  %s2324_s15 = sphi %s2402_s15, %s2816_s15   ;;  %s2320_s14 = sphi %s2400_s14, %s2818_s14   ;;  %s2316_s13 = sphi %s2398_s13, %s2817_s13  }
  0x10   : > { %s1523_s18 = sadd.s32 4294967294, %s2328_s16   ;;  %p51_p0 = scmp.ne.s32.totalorder %s2320_s14, %s2316_s13 }
  0x11   : > { %p2768_p1 = scmp.eq.s32.totalorder %s2419_s17, 0  ;;  %p269_p2 = scmp.eq.s32.totalorder %s2419_s17, 1 }
  0x12   : > { %p275_p3 = scmp.eq.s32.totalorder %s1523_s18, 1  ;;  %p1524_p5 = scmp.ge.s32.totalorder %s2328_s16, 1 }
  0x13   : > { %p2428_p4 = por %p2768_p1, %p51_p0  ;;  %p282_p7 = scmp.lt.s32.totalorder %s2328_s16, 3 }
  0x14   : > { %p2433_p6 = por %p275_p3, %p51_p0  ;;  %s2330_s22 = smov [#allocation7]  }
  0x15   : > { %s2784_s19 = scalar_select %p2428_p4, 1, 0 }
  0x16   : > { %s2785_s20 = scalar_select %p2433_p6, 1, 0 }
  0x17   : > { %p2438_p8 = pnand %p1524_p5, %p282_p7  ;;  %s294_s23 = sshll.u32 %s2330_s22, 4  ;;  %s295_s23 = int_to_ptr.vmem [resolvable:$true] %s294_s23 }
  0x18   : > { %2786 = sst [smem:[#allocation21_spill]] %s2785_s20  ;;  %s2331_s25 = smov [#allocation8]  }
  0x19   : > { %s2787_s21 = scalar_select %p2438_p8, 1, 0 }
  0x1a   : > { %p1996_p9 = pneg %p2438_p8  ;;  %s310_s26 = sshll.u32 %s2331_s25, 4  ;;  %s311_s26 = int_to_ptr.vmem [resolvable:$true] %s310_s26 }
  0x1b   : > { %s2332_s27 = smov [#allocation10]   ;;  %s2099_s29 = scalar_lea.vmem %s295_s23, 6144 }
  0x1c   : > { %p2447_p11 = pnand %p1996_p9, %p2768_p1  ;;  %s326_s28 = sshll.u32 %s2332_s27, 4  ;;  %s327_s28 = int_to_ptr.vmem [resolvable:$true] %s326_s28 }
  0x1d   : > { %p2100_p13 = scmp.ne.s32.totalorder %s295_s23, %s2099_s29  ;;  %p2107_p5 = scmp.lt.s32.totalorder %s295_s23, %s295_s23 }
  0x1e   : > { %p2090_p12 = pneg %p2447_p11  ;;  %p2108_p7 = scmp.lt.s32.totalorder %s2099_s29, %s2099_s29 }
  0x20   : > { %p2102_p0 = pnand %p2100_p13, %p2090_p12  ;;  %p2109_p9 = por %p2108_p7, %p2107_p5 }
  0x22   : > { %p2103_p3 = pneg %p2102_p0 }
  0x24   : > { %p2110_p10 = pnand %p2109_p9, %p2103_p3 }
  0x26   : > { %2113 = shalt.err (!%p2110_p10)
}
  0x27   : > { %s2769_s30 = smov 128   ;;  %s2770_s11 = smov 8  }
  0x28   : > { %s2789_s2 = sld [smem:[#allocation25_spill]]  ;;  %s2125_s22 = scalar_lea.vmem %s311_s26, 2048 }
  0x29   : > { %p2126_p13 = scmp.ne.s32.totalorder %s311_s26, %s2125_s22  ;;  %p2133_p3 = scmp.lt.s32.totalorder %s311_s26, %s311_s26 }
  0x2a   : > { %p2134_p10 = scmp.lt.s32.totalorder %s2125_s22, %s2125_s22 }
  0x2b   : > { %p2128_p0 = pnand %p2126_p13, %p2090_p12 }
  0x2c   : > { %p2135_p7 = por %p2134_p10, %p2133_p3 }
  0x2d   : > { %p2129_p5 = pneg %p2128_p0 }
  0x2e   : > { %1999 = dma.hbm_to_vmem [thread:$0]  (!%p2447_p11), %s2789_s2, 6144, %s295_s23, [#allocation6], %s2769_s30, %s2769_s30, %s2770_s11  }
  0x2f   : > { %p2136_p9 = pnand %p2135_p7, %p2129_p5 }
  0x31   : > { %2139 = shalt.err (!%p2136_p9)
}
  0x32   : > { %s2790_s4 = sld [smem:[#allocation26_spill]]  ;;  %s2151_s23 = scalar_lea.vmem %s327_s28, 6144 }
  0x33   : > { %p2152_p1 = scmp.ne.s32.totalorder %s327_s28, %s2151_s23  ;;  %p2159_p3 = scmp.lt.s32.totalorder %s327_s28, %s327_s28 }
  0x34   : > { %p2160_p5 = scmp.lt.s32.totalorder %s2151_s23, %s2151_s23 }
  0x35   : > { %p2154_p13 = pnand %p2152_p1, %p2090_p12 }
  0x36   : > { %p2161_p10 = por %p2160_p5, %p2159_p3 }
  0x37   : > { %p2155_p0 = pneg %p2154_p13 }
  0x38   : > { %2002 = dma.hbm_to_vmem [thread:$0]  (!%p2447_p11), %s2790_s4, 2048, %s311_s26, [#allocation9], %s2769_s30, %s2769_s30, %s2770_s11  }
  0x39   : > { %p2162_p7 = pnand %p2161_p10, %p2155_p0 }
  0x3b   : > { %2165 = shalt.err (!%p2162_p7)
}
  0x3c   : > { %s2791_s6 = sld [smem:[#allocation27_spill]]  ;;  %s2335_s26 = smov [#allocation11]  }
  0x3d   : > { %s342_s18 = sshll.u32 %s2335_s26, 4  ;;  %s343_s18 = int_to_ptr.vmem [resolvable:$true] %s342_s18 }
  0x3e   : > { %s2177_s22 = scalar_lea.vmem %s343_s18, 2048  ;;  %p2185_p0 = scmp.lt.s32.totalorder %s343_s18, %s343_s18 }
  0x3f   : > { %p2178_p1 = scmp.ne.s32.totalorder %s343_s18, %s2177_s22  ;;  %p2186_p3 = scmp.lt.s32.totalorder %s2177_s22, %s2177_s22 }
  0x41   : > { %p2180_p9 = pnand %p2178_p1, %p2090_p12  ;;  %p2187_p5 = por %p2186_p3, %p2185_p0 }
  0x42   : > { %2005 = dma.hbm_to_vmem [thread:$0]  (!%p2447_p11), %s2791_s6, 6144, %s327_s28, [#allocation9], %s2769_s30, %s2769_s30, %s2770_s11  }
  0x43   : > { %p2181_p13 = pneg %p2180_p9 }
  0x45   : > { %p2188_p10 = pnand %p2187_p5, %p2181_p13 }
  0x47   : > { %2191 = shalt.err (!%p2188_p10)
}
  0x48   : > { %s2792_s8 = sld [smem:[#allocation28_spill]]  ;;  %s2498_s27 = sadd.s32 1, %s2328_s16  }
  0x49   : > { %2793 = sst [smem:[#allocation22_spill]] %s2498_s27  ;;  %s38_s24 = sadd.s32 1, %s2324_s15 }
  0x4a   : > { %s35_s23 = ssub.s32 %s2328_s16, %s2498_s27  ;;  %p45_p12 = scmp.ne.s32.totalorder %s2324_s15, %s2320_s14 }
  0x4b   : > { %p36_p7 = scmp.eq.s32.totalorder %s35_s23, 0  ;;  %p46_p1 = scmp.eq.s32.totalorder %s2328_s16, 0 }
  0x4c   : > { %p2508_p9 = por %p269_p2, %p45_p12  ;;  %p2024_p13 = scmp.lt.s32.totalorder %s2328_s16, 2 }
  0x4d   : > { %s2514_s12 = scalar_select %p36_p7, %s2324_s15, %s38_s24  }
  0x4e   : > { %2008 = dma.hbm_to_vmem [thread:$0]  (!%p2447_p11), %s2792_s8, 2048, %s343_s18, [#allocation12], %s2769_s30, %s2769_s30, %s2770_s11  }
  0x4f   : > { %s2794_s29 = scalar_select %p2508_p9, 1, 0 }
  0x50   : > { %2795 = sst [smem:[#allocation23_spill]] %s2514_s12  ;;  %p47_p0 = por %p46_p1, %p45_p12 }
  0x51   : > { %s2517_s26 = sand.u32 1, %s2324_s15   ;;  %s1549_s22 = sshll.u32 %s2328_s16, 8 }
  0x52   : > { %s1530_s18 = sshll.u32 %s2517_s26, 4  ;;  %s2796_s0 = sld [smem:[#allocation24_spill]] }
  0x53   : > { %s363_s30 = scalar_lea.vmem [#allocation2], %s1530_s18  ;;  %p2528_p2 = pnand %p2024_p13, %p47_p0 }
  0x54   : > { %s370_s11 = sshll.u32 %s363_s30, 4  ;;  %s2526_s11 = int_to_ptr.vmem [resolvable:$true] %s370_s11 }
  0x55   : > { %p2194_p3 = pneg %p2528_p2 }
  0x58   : > { %s2524_s23 = scalar_lea.hbm %s2796_s0, %s1549_s22  ;;  %s2197_s22 = scalar_lea.hbm %s2796_s0, 512 }
  0x59   : > { %s2192_s6 = scalar_lea.hbm %s2524_s23, 256  ;;  %p2198_p12 = scmp.lt.s32.totalorder %s2524_s23, %s2796_s0 }
  0x5a   : > { %p2193_p11 = scmp.ne.s32.totalorder %s2524_s23, %s2192_s6  ;;  %p2199_p7 = scmp.lt.s32.totalorder %s2197_s22, %s2192_s6 }
  0x5c   : > { %p2195_p5 = pnand %p2194_p3, %p2193_p11  ;;  %p2200_p1 = por %p2199_p7, %p2198_p12 }
  0x5e   : > { %p2196_p10 = pneg %p2195_p5 }
  0x60   : > { %p2201_p13 = pnand %p2200_p1, %p2196_p10 }
  0x62   : > { %2204 = shalt.err (!%p2201_p13)
}
  0x63   : > { %s2205_s2 = scalar_lea.vmem %s2526_s11, 256  ;;  %s2336_s18 = smov [#allocation2]  }
  0x64   : > { %p2206_p0 = scmp.ne.s32.totalorder %s2526_s11, %s2205_s2  ;;  %s2210_s30 = sshll.u32 %s2336_s18, 4  ;;  %s2211_s30 = int_to_ptr.vmem [resolvable:$false] %s2210_s30 }
  0x65   : > { %s2212_s4 = scalar_lea.vmem %s2211_s30, 512  ;;  %p2213_p6 = scmp.lt.s32.totalorder %s2526_s11, %s2211_s30 }
  0x66   : > { %p2208_p11 = pnand %p2206_p0, %p2194_p3  ;;  %p2214_p9 = scmp.lt.s32.totalorder %s2212_s4, %s2205_s2 }
  0x68   : > { %p2209_p5 = pneg %p2208_p11  ;;  %p2215_p4 = por %p2214_p9, %p2213_p6 }
  0x6a   : > { %p2216_p12 = pnand %p2215_p4, %p2209_p5 }
  0x6c   : > { %2219 = shalt.err (!%p2216_p12)
}
  0x6d   : > { %s2798_s6 = smov 8   ;;  %s2799_s22 = smov 128  }
  0x6e   : > { %s2800_s28 = scalar_lea.sflag [#allocation3], %s2517_s26  ;;  %s1533_s25 = sshll.u32 %s2328_s16, 4 }
  0x6f   : > { %2012 = dma.hbm_to_vmem [thread:$0]  (!%p2528_p2), %s2524_s23, 256, %s2526_s11, %s2800_s28, %s2799_s22, %s2799_s22, %s2798_s6  }
  0x70   : > { %s383_s18 = scalar_lea.vmem [#allocation5], %s2517_s26  ;;  %s388_s0 = scalar_lea.hbm %s2758_s1, %s1533_s25 }
  0x71   : > { %s390_s2 = sshll.u32 %s383_s18, 4  ;;  %s2801_s8 = sand.u32 1, %s2328_s16   ;;  %s391_s2 = int_to_ptr.vmem [resolvable:$true] %s390_s2 }
  0x72   : > { %s381_s12 = scalar_lea.sflag [#allocation6], %s2801_s8  ;;  %s2220_s15 = scalar_lea.hbm %s388_s0, 16 }
  0x73   : > { %p2221_p4 = scmp.ne.s32.totalorder %s388_s0, %s2220_s15  ;;  %s2225_s11 = scalar_lea.hbm %s2758_s1, 32 }
  0x74   : > { %p2226_p10 = scmp.lt.s32.totalorder %s388_s0, %s2758_s1  ;;  %p2227_p7 = scmp.lt.s32.totalorder %s2225_s11, %s2220_s15 }
  0x75   : > { %p2223_p6 = pnand %p2221_p4, %p2194_p3 }
  0x76   : > { %p2228_p1 = por %p2227_p7, %p2226_p10 }
  0x77   : > { %p2224_p9 = pneg %p2223_p6 }
  0x79   : > { %p2229_p13 = pnand %p2228_p1, %p2224_p9 }
  0x7b   : > { %2232 = shalt.err (!%p2229_p13)
}
  0x7c   : > { %s2233_s6 = scalar_lea.vmem %s391_s2, 16  ;;  %s2337_s8 = smov [#allocation5]  }
  0x7d   : > { %p2234_p0 = scmp.ne.s32.totalorder %s391_s2, %s2233_s6  ;;  %s2238_s22 = sshll.u32 %s2337_s8, 4  ;;  %s2239_s22 = int_to_ptr.vmem [resolvable:$false] %s2238_s22 }
  0x7e   : > { %s2240_s20 = scalar_lea.vmem %s2239_s22, 32  ;;  %p2241_p12 = scmp.lt.s32.totalorder %s391_s2, %s2239_s22 }
  0x7f   : > { %p2236_p11 = pnand %p2234_p0, %p2194_p3  ;;  %p2242_p4 = scmp.lt.s32.totalorder %s2240_s20, %s2233_s6 }
  0x81   : > { %p2237_p5 = pneg %p2236_p11  ;;  %p2243_p6 = por %p2242_p4, %p2241_p12 }
  0x83   : > { %p2244_p8 = pnand %p2243_p6, %p2237_p5 }
  0x85   : > { %2247 = shalt.err (!%p2244_p8)
}
  0x86   : > { %2015 = dma.hbm_to_vmem [thread:$0]  (!%p2528_p2), %s388_s0, 16, %s391_s2, %s381_s12  }
  0x87   : > { %p2802_p9 = scmp.ne.s32.totalorder %s2787_s21, 0 }
  0x88   : > { %s2587_s15 = sand.u32 (!%p2802_p9), 1, %s2320_s14   ;;  %p2803_p3 = scmp.ne.s32.totalorder (!%p2802_p9), %s2784_s19, 0 }
  0x89   : > { %399 = sbr.rel (%p2802_p9) target bundleno = 750 (0x2ee), region = 60  ;;  %s1535_s27 = sshll.u32 (!%p2802_p9), %s2587_s15, 4 }
  0x8a   : > { %s402_s28 = scalar_lea.sflag (!%p2802_p9), [#allocation3], %s2587_s15  ;;  %s2593_s25 = scalar_lea.vmem (!%p2802_p9), [#allocation2], %s1535_s27 }
  0x8e   : > { %2291 = dma.done.wait (%p2803_p3), %s402_s28, 256  }
  0x8f   : > { %2293 = vsyncadd (%p2803_p3), %s402_s28, 4294967040  ;;  %s410_s0 = sand.u32 1, %s2419_s17   ;;  %s413_s12 = scalar_lea.vmem [#allocation5], %s2587_s15 }
  0x90   : > { %s411_s21 = scalar_lea.sflag [#allocation6], %s410_s0 }
  0x91   : > { %2295 = dma.done.wait (%p2803_p3), %s411_s21, 16  }
  0x92   : > { %2297 = vsyncadd (%p2803_p3), %s411_s21, 4294967280  ;;  %p2804_p8 = scmp.eq.s32.totalorder %s2419_s17, 0 }
  0x94   : > { %2299 = dma.done.wait (%p2804_p8), [#allocation6], 6144   ;;  %p2805_p2 = pmov %p2804_p8 }
  0x96   : > { %2301 = vsyncadd (%p2805_p2), [#allocation6], 4294961152  ;;  %p2806_p10 = pmov %p2805_p2 }
  0x97   : > { %p2807_p7 = pmov %p2805_p2 }
  0x98   : > { %2303 = dma.done.wait (%p2806_p10), [#allocation9], 8192  }
  0x99   : > { %2305 = vsyncadd (%p2807_p7), [#allocation9], 4294959104  ;;  %p2808_p1 = pmov %p2805_p2 }
  0x9b   : > { %2307 = dma.done.wait (%p2808_p1), [#allocation12], 2048   ;;  %p2809_p13 = pmov %p2808_p1 }
  0x9c   : > { %v2338_v0 = vmov 0.0   ;;  %vm2339_vm0 = vmmov 0   ;;  %v488_v1 = vld [vmem:[#allocation8 + $0x78] sm:$0xff]  ;;  %v487_v2 = vld [vmem:[#allocation8 + $0x70] sm:$0xff]  ;;  %v486_v3 = vld [vmem:[#allocation8 + $0x68] sm:$0xff]  ;;  %vm616_vm3 = vcmask 1040384  }
  0x9d   : > { %2309 = vsyncadd (%p2809_p13), [#allocation12], 4294965248  ;;  %1694 = vmatprep.subr.mxu0 %v2338_v0  ;;  %1726 = vmatprep.mubr.msk.f32.mxu0 %vm2339_vm0, %v2338_v0  ;;  %v654_v4 = vld [vmem:[#allocation7 + $0xf8] sm:$0xff]  ;;  %v485_v5 = vld [vmem:[#allocation8 + $0x60] sm:$0xff]  ;;  %vm805_vm4 = vcmask 1046528   ;;  %s469_s26 = scalar_lea.vmem [#allocation13], %s1535_s27 }
  0x9e   : > { %1695 = vmatpush3.msra.mxu0 %v488_v1  ;;  %1729 = vmatprep.subr.mxu1 %v654_v4  ;;  %v653_v6 = vld [vmem:[#allocation7 + $0xf0] sm:$0xff]  ;;  %v652_v7 = vld [vmem:[#allocation7 + $0xe8] sm:$0xff]  ;;  %v484_v8 = vld [vmem:[#allocation8 + $0x58] sm:$0xff]  ;;  %s1392_s6 = sshll.u32 %s469_s26, 4  ;;  %s1550_s8 = sshll.u32 %s2419_s17, 8  ;;  %s2709_s6 = int_to_ptr.vmem [resolvable:$true] %s1392_s6 }
  0x9f   : > { %1696 = vmatprep.subr.mxu0 %v2338_v0  ;;  %1730 = vmatpush3.msra.mxu1 %v654_v4  ;;  %v651_v9 = vld [vmem:[#allocation7 + $0xe0] sm:$0xff]  ;;  %v483_v10 = vld [vmem:[#allocation8 + $0x50] sm:$0xff]  ;;  %v650_v11 = vld [vmem:[#allocation7 + $0xd8] sm:$0xff]  ;;  %s2714_s28 = scalar_lea.hbm %s2767_s10, %s1550_s8  ;;  %s1379_s27 = scalar_lea.sflag [#allocation4], %s2587_s15 }
  0xa0   : > { %1697 = vmatpush3.msra.mxu0 %v487_v2  ;;  %1731 = vmatprep.subr.mxu1 %v653_v6  ;;  %v482_v12 = vld [vmem:[#allocation8 + $0x48] sm:$0xff]  ;;  %v649_v13 = vld [vmem:[#allocation7 + $0xd0] sm:$0xff]  ;;  %v481_v14 = vld [vmem:[#allocation8 + $0x40] sm:$0xff]  ;;  %p2810_p11 = scmp.ne.s32.totalorder %s2794_s29, 0  ;;  %s2340_s17 = smov [#allocation13]  }
  0xa1   : > { %1698 = vmatprep.subr.mxu0 %v2338_v0  ;;  %1732 = vmatpush3.msra.mxu1 %v653_v6  ;;  %v648_v15 = vld [vmem:[#allocation7 + $0xc8] sm:$0xff]  ;;  %v480_v16 = vld [vmem:[#allocation8 + $0x38] sm:$0xff]  ;;  %v647_v18 = vld [vmem:[#allocation7 + $0xc0] sm:$0xff]  ;;  %s2252_s0 = sshll.u32 %s2340_s17, 4  ;;  %s2253_s0 = int_to_ptr.vmem [resolvable:$false] %s2252_s0 }
  0xa2   : > { %1699 = vmatpush3.msra.mxu0 %v486_v3  ;;  %1733 = vmatprep.subr.mxu1 %v652_v7  ;;  %v2627_v17 = vld [vmem:[%s2593_s25] sm:$0xff]  ;;  %v2633_v20 = vld [vmem:[%s2593_s25 + $0x8] sm:$0xff]  ;;  %s2248_s25 = scalar_lea.vmem %s2709_s6, 256  ;;  %s2254_s21 = scalar_lea.vmem %s2253_s0, 512 }
  0xa3   : > { %1700 = vmatprep.subr.mxu0 %v2338_v0  ;;  %1734 = vmatpush3.msra.mxu1 %v652_v7  ;;  %v2630_v19 = vmul.f32 0.70710677, %v2627_v17  ;;  %v479_v21 = vld [vmem:[#allocation8 + $0x30] sm:$0xff]  ;;  %v2637_v22 = vmul.f32 0.70710677, %v2633_v20  ;;  %v646_v23 = vld [vmem:[#allocation7 + $0xb8] sm:$0xff]  ;;  %p2249_p0 = scmp.ne.s32.totalorder %s2709_s6, %s2248_s25  ;;  %p2255_p4 = scmp.lt.s32.totalorder %s2709_s6, %s2253_s0 }
  0xa4   : > { %1701 = vmatpush3.msra.mxu0 %v485_v5  ;;  %1735 = vmatprep.subr.mxu1 %v651_v9  ;;  %v478_v25 = vld [vmem:[#allocation8 + $0x28] sm:$0xff]  ;;  %v645_v27 = vld [vmem:[#allocation7 + $0xb0] sm:$0xff]  ;;  %v477_v29 = vld [vmem:[#allocation8 + $0x20] sm:$0xff]  ;;  %p2256_p6 = scmp.lt.s32.totalorder %s2254_s21, %s2248_s25 }
  0xa5   : > { %1702 = vmatprep.subr.mxu0 %v2338_v0  ;;  %1736 = vmatpush3.msra.mxu1 %v651_v9  ;;  %v562_v24 = vand.u32 2147483647, %v2630_v19  ;;  %v563_v26 = vand.u32 2147483647, %v2637_v22  ;;  %v644_v31 = vld [vmem:[#allocation7 + $0xa8] sm:$0xff]  ;;  %v476_v33 = vld [vmem:[#allocation8 + $0x18] sm:$0xff]  ;;  %p2250_p5 = pnand %p2249_p0, %p2810_p11 }
  0xa6   : > { %1703 = vmatpush3.msra.mxu0 %v484_v8  ;;  %1737 = vmatprep.subr.mxu1 %v650_v11  ;;  %v643_v35 = vld [vmem:[#allocation7 + $0xa0] sm:$0xff]  ;;  %v475_v36 = vld [vmem:[#allocation8 + $0x10] sm:$0xff]  ;;  %v642_v37 = vld [vmem:[#allocation7 + $0x98] sm:$0xff]  ;;  %vm602_vm1 = vcmp.ge.f32.partialorder %v2630_v19, 0.0  ;;  %vm603_vm2 = vcmp.ge.f32.partialorder %v2637_v22, 0.0  ;;  %p2257_p9 = por %p2256_p6, %p2255_p4 }
  0xa7   : > { %1704 = vmatprep.subr.mxu0 %v2338_v0  ;;  %1738 = vmatpush3.msra.mxu1 %v650_v11  ;;  %v564_v28 = vmul.f32 0.3275911, %v562_v24  ;;  %v565_v30 = vmul.f32 0.3275911, %v563_v26  ;;  %v474_v38 = vld [vmem:[#allocation8 + $0x8] sm:$0xff]  ;;  %v641_v39 = vld [vmem:[#allocation7 + $0x90] sm:$0xff]  ;;  %p2251_p12 = pneg %p2250_p5 }
  0xa8   : > { %1705 = vmatpush3.msra.mxu0 %v483_v10  ;;  %1739 = vmatprep.subr.mxu1 %v649_v13  ;;  %v590_v40 = vsub.f32 0.0, %v562_v24  ;;  %v473_v41 = vld [vmem:[#allocation8] sm:$0xff]  ;;  %v591_v42 = vsub.f32 0.0, %v563_v26  ;;  %v637_v43 = vld [vmem:[#allocation7 + $0x78] sm:$0xff]  ;;  %v640_v45 = vld [vmem:[#allocation7 + $0x88] sm:$0xff] }
  0xa9   : > { %1706 = vmatprep.subr.mxu0 %v2338_v0  ;;  %1740 = vmatpush3.msra.mxu1 %v649_v13  ;;  %v566_v32 = vadd.f32 1.0, %v564_v28  ;;  %v567_v34 = vadd.f32 1.0, %v565_v30  ;;  %v472_v44 = vld [vmem:[%s413_s12] sm:$0x1]  ;;  %v636_v46 = vld [vmem:[#allocation7 + $0x70] sm:$0xff]  ;;  %v639_v48 = vld [vmem:[#allocation7 + $0x80] sm:$0xff]  ;;  %p2258_p3 = pnand %p2257_p9, %p2251_p12 }
  0xaa   : > { %1707 = vmatpush3.msra.mxu0 %v482_v12  ;;  %1741 = vmatprep.subr.mxu1 %v648_v15  ;;  %v592_v47 = vmul.f32 %v590_v40, %v562_v24  ;;  %v593_v49 = vmul.f32 %v591_v42, %v563_v26  ;;  %v635_v50 = vld [vmem:[#allocation7 + $0x68] sm:$0xff]  ;;  %v2650_v51 = vld [vmem:[#allocation7 + $0x178] sm:$0xff]  ;;  %v634_v52 = vld [vmem:[#allocation7 + $0x60] sm:$0xff] }
  0xab   : > { %1708 = vmatprep.subr.mxu0 %v2338_v0  ;;  %1742 = vmatpush3.msra.mxu1 %v648_v15  ;;  %2072 = vrcp.f32 %v566_v32  ;;  %v633_v57 = vld [vmem:[#allocation7 + $0x58] sm:$0xff]  ;;  %v632_v60 = vld [vmem:[#allocation7 + $0x50] sm:$0xff]  ;;  %v631_v63 = vld [vmem:[#allocation7 + $0x48] sm:$0xff] }
  0xac   : > { %1709 = vmatpush3.msra.mxu0 %v481_v14  ;;  %1743 = vmatprep.subr.mxu1 %v647_v18  ;;  %2074 = vrcp.f32 %v567_v34  ;;  %v594_v53 = vmul.f32 1.442695, %v592_v47  ;;  %v596_v55 = vmul.f32 1.442695, %v593_v49  ;;  %v630_v2 = vld [vmem:[#allocation7 + $0x40] sm:$0xff]  ;;  %v629_v5 = vld [vmem:[#allocation7 + $0x38] sm:$0xff] }
  0xad   : > { %1710 = vmatprep.subr.mxu0 %v2338_v0  ;;  %1744 = vmatpush3.msra.mxu1 %v647_v18  ;;  %v628_v8 = vld [vmem:[#allocation7 + $0x30] sm:$0xff]  ;;  %v627_v12 = vld [vmem:[#allocation7 + $0x28] sm:$0xff]  ;;  %v626_v15 = vld [vmem:[#allocation7 + $0x20] sm:$0xff] }
  0xae   : > { %1711 = vmatpush3.msra.mxu0 %v480_v16  ;;  %1745 = vmatprep.subr.mxu1 %v646_v23  ;;  %2076 = vpow2.f32 %v594_v53  ;;  %v625_v24 = vld [vmem:[#allocation7 + $0x18] sm:$0xff]  ;;  %v623_v30 = vld [vmem:[#allocation7 + $0x8] sm:$0xff]  ;;  %v828_v40 = vld [vmem:[#allocation7 + $0x170] sm:$0xff] }
  0xaf   : > { %1712 = vmatprep.subr.mxu0 %v2338_v0  ;;  %1746 = vmatpush3.msra.mxu1 %v646_v23  ;;  %2078 = vpow2.f32 %v596_v55  ;;  %v825_v49 = vld [vmem:[#allocation7 + $0x158] sm:$0xff]  ;;  %v819_v55 = vld [vmem:[#allocation7 + $0x128] sm:$0xff] }
  0xb0   : > { %1713 = vmatpush3.msra.mxu0 %v479_v21  ;;  %1747 = vmatprep.subr.mxu1 %v645_v27  ;;  %v821_v53 = vld [vmem:[#allocation7 + $0x138] sm:$0xff] }
  0xb1   : > { %1714 = vmatprep.subr.mxu0 %v2338_v0  ;;  %1748 = vmatpush3.msra.mxu1 %v645_v27  ;;  %v624_v27 = vld [vmem:[#allocation7 + $0x10] sm:$0xff] }
  0xb2   : > { %1715 = vmatpush3.msra.mxu0 %v478_v25  ;;  %1749 = vmatprep.subr.mxu1 %v644_v31 }
  0xb3   : > { %1716 = vmatprep.subr.mxu0 %v2338_v0  ;;  %1750 = vmatpush3.msra.mxu1 %v644_v31 }
  0xb4   : > { %1717 = vmatpush3.msra.mxu0 %v477_v29  ;;  %1751 = vmatprep.subr.mxu1 %v643_v35 }
  0xb5   : > { %1718 = vmatprep.subr.mxu0 %v2338_v0  ;;  %1752 = vmatpush3.msra.mxu1 %v643_v35 }
  0xb6   : > { %1719 = vmatpush3.msra.mxu0 %v476_v33  ;;  %1753 = vmatprep.subr.mxu1 %v642_v37  ;;  %v622_v33 = vld [vmem:[#allocation7] sm:$0xff] }
  0xb7   : > { %1720 = vmatprep.subr.mxu0 %v2338_v0  ;;  %1754 = vmatpush3.msra.mxu1 %v642_v37 }
  0xb8   : > { %1721 = vmatpush3.msra.mxu0 %v475_v36  ;;  %1755 = vmatprep.subr.mxu1 %v641_v39  ;;  %v2073_v54 = vpop.eup %2072 }
  0xb9   : > { %1722 = vmatprep.subr.mxu0 %v2338_v0  ;;  %1756 = vmatpush3.msra.mxu1 %v641_v39  ;;  %v2075_v56 = vpop.eup %2074  ;;  %v572_v58 = vmul.f32 1.0614054, %v2073_v54 }
  0xba   : > { %1723 = vmatpush3.msra.mxu0 %v474_v38  ;;  %1757 = vmatprep.subr.mxu1 %v640_v45  ;;  %v573_v59 = vmul.f32 1.0614054, %v2075_v56 }
  0xbb   : > { %1724 = vmatprep.subr.mxu0 %v2338_v0  ;;  %1758 = vmatpush3.msra.mxu1 %v640_v45  ;;  %v574_v61 = vadd.f32 -1.4531521, %v572_v58  ;;  %v2077_v16 = vpop.eup %2076  ;;  %v816_v58 = vld [vmem:[#allocation7 + $0x110] sm:$0xff] }
  0xbc   : > { %1725 = vmatpush3.msra.mxu0 %v473_v41  ;;  %1759 = vmatprep.subr.mxu1 %v639_v48  ;;  %v575_v62 = vadd.f32 -1.4531521, %v573_v59  ;;  %v2079_v21 = vpop.eup %2078  ;;  %v815_v59 = vld [vmem:[#allocation7 + $0x108] sm:$0xff] }
  0xbd   : > { %1764 = vmatprep.subr.mxu0 %v637_v43  ;;  %1727 = vmatmul.mubr.f32.vlgmr.msra.gmra.mxu0 %v472_v44  ;;  %v576_v0 = vmul.f32 %v2073_v54, %v574_v61  ;;  %v827_v44 = vld [vmem:[#allocation7 + $0x168] sm:$0xff] }
  0xbe   : > { %1765 = vmatpush3.msra.mxu0 %v637_v43  ;;  %1760 = vmatpush3.msra.mxu1 %v639_v48  ;;  %v577_v1 = vmul.f32 %v2075_v56, %v575_v62  ;;  %v826_v48 = vld [vmem:[#allocation7 + $0x160] sm:$0xff]  ;;  %v1015_v62 = vld [vmem:[#allocation10 + $0xf8] sm:$0xff] }
  0xbf   : > { %1766 = vmatprep.subr.mxu0 %v636_v46  ;;  %1799 = vmatprep.subr.mxu1 %v2650_v51  ;;  %v578_v3 = vadd.f32 1.4214138, %v576_v0  ;;  %v998_v0 = vld [vmem:[#allocation10 + $0x78] sm:$0xff] }
  0xc0   : > { %1767 = vmatpush3.msra.mxu0 %v636_v46  ;;  %v579_v4 = vadd.f32 1.4214138, %v577_v1  ;;  %v1013_v1 = vld [vmem:[#allocation10 + $0xe8] sm:$0xff] }
  0xc1   : > { %1768 = vmatprep.subr.mxu0 %v635_v50  ;;  %v580_v6 = vmul.f32 %v2073_v54, %v578_v3  ;;  %v1012_v3 = vld [vmem:[#allocation10 + $0xe0] sm:$0xff] }
  0xc2   : > { %1769 = vmatpush3.msra.mxu0 %v635_v50  ;;  %v581_v7 = vmul.f32 %v2075_v56, %v579_v4  ;;  %v824_v50 = vld [vmem:[#allocation7 + $0x150] sm:$0xff]  ;;  %v996_v4 = vld [vmem:[#allocation10 + $0x68] sm:$0xff] }
  0xc3   : > { %1770 = vmatprep.subr.mxu0 %v634_v52  ;;  %v582_v9 = vadd.f32 -0.28449672, %v580_v6  ;;  %v995_v6 = vld [vmem:[#allocation10 + $0x60] sm:$0xff] }
  0xc4   : > { %1771 = vmatpush3.msra.mxu0 %v634_v52  ;;  %v583_v10 = vadd.f32 -0.28449672, %v581_v7  ;;  %v822_v52 = vld [vmem:[#allocation7 + $0x140] sm:$0xff]  ;;  %v1010_v7 = vld [vmem:[#allocation10 + $0xd0] sm:$0xff] }
  0xc5   : > { %1772 = vmatprep.subr.mxu0 %v633_v57  ;;  %v584_v11 = vmul.f32 %v2073_v54, %v582_v9  ;;  %v1009_v9 = vld [vmem:[#allocation10 + $0xc8] sm:$0xff] }
  0xc6   : > { %1773 = vmatpush3.msra.mxu0 %v633_v57  ;;  %v585_v13 = vmul.f32 %v2075_v56, %v583_v10  ;;  %v817_v57 = vld [vmem:[#allocation7 + $0x118] sm:$0xff]  ;;  %v993_v10 = vld [vmem:[#allocation10 + $0x50] sm:$0xff] }
  0xc7   : > { %1774 = vmatprep.subr.mxu0 %v632_v60  ;;  %v586_v14 = vadd.f32 0.2548296, %v584_v11  ;;  %v1008_v11 = vld [vmem:[#allocation10 + $0xc0] sm:$0xff] }
  0xc8   : > { %1775 = vmatpush3.msra.mxu0 %v632_v60  ;;  %v587_v18 = vadd.f32 0.2548296, %v585_v13  ;;  %v814_v60 = vld [vmem:[#allocation7 + $0x100] sm:$0xff]  ;;  %v1007_v13 = vld [vmem:[#allocation10 + $0xb8] sm:$0xff] }
  0xc9   : > { %1776 = vmatprep.subr.mxu0 %v631_v63  ;;  %v588_v23 = vmul.f32 %v2073_v54, %v586_v14  ;;  %v820_v54 = vld [vmem:[#allocation7 + $0x130] sm:$0xff]  ;;  %v991_v14 = vld [vmem:[#allocation10 + $0x40] sm:$0xff] }
  0xca   : > { %1777 = vmatpush3.msra.mxu0 %v631_v63  ;;  %v589_v25 = vmul.f32 %v2075_v56, %v587_v18  ;;  %v818_v56 = vld [vmem:[#allocation7 + $0x120] sm:$0xff]  ;;  %v1014_v63 = vld [vmem:[#allocation10 + $0xf0] sm:$0xff]  ;;  %v1005_v18 = vld [vmem:[#allocation10 + $0xa8] sm:$0xff] }
  0xcb   : > { %1778 = vmatprep.subr.mxu0 %v630_v2  ;;  %v598_v26 = vmul.f32 %v2077_v16, %v588_v23  ;;  %v990_v16 = vld [vmem:[#allocation10 + $0x38] sm:$0xff]  ;;  %v1004_v23 = vld [vmem:[#allocation10 + $0xa0] sm:$0xff] }
  0xcc   : > { %1779 = vmatpush3.msra.mxu0 %v630_v2  ;;  %v599_v28 = vmul.f32 %v2079_v21, %v589_v25  ;;  %v997_v2 = vld [vmem:[#allocation10 + $0x70] sm:$0xff]  ;;  %v1003_v25 = vld [vmem:[#allocation10 + $0x98] sm:$0xff] }
  0xcd   : > { %1780 = vmatprep.subr.mxu0 %v629_v5  ;;  %v600_v29 = vsub.f32 1.0, %v598_v26  ;;  %v989_v21 = vld [vmem:[#allocation10 + $0x30] sm:$0xff]  ;;  %v987_v26 = vld [vmem:[#allocation10 + $0x20] sm:$0xff] }
  0xce   : > { %1781 = vmatpush3.msra.mxu0 %v629_v5  ;;  %v601_v31 = vsub.f32 1.0, %v599_v28  ;;  %v1011_v5 = vld [vmem:[#allocation10 + $0xd8] sm:$0xff] }
  0xcf   : > { %1782 = vmatprep.subr.mxu0 %v628_v8  ;;  %v604_v32 = vsub.f32 0.0, %v600_v29  ;;  %v986_v28 = vld [vmem:[#allocation10 + $0x18] sm:$0xff] }
  0xd0   : > { %1783 = vmatpush3.msra.mxu0 %v628_v8  ;;  %v605_v34 = vsub.f32 0.0, %v601_v31  ;;  %v994_v8 = vld [vmem:[#allocation10 + $0x58] sm:$0xff] }
  0xd1   : > { %1784 = vmatprep.subr.mxu0 %v627_v12  ;;  %v606_v35 = vsel %vm602_vm1, %v600_v29, %v604_v32  ;;  %v1001_v29 = vld [vmem:[#allocation10 + $0x88] sm:$0xff] }
  0xd2   : > { %1785 = vmatpush3.msra.mxu0 %v627_v12  ;;  %v608_v36 = vadd.f32 1.0, %v606_v35  ;;  %v607_v37 = vsel %vm603_vm2, %v601_v31, %v605_v34  ;;  %v992_v12 = vld [vmem:[#allocation10 + $0x48] sm:$0xff]  ;;  %v1000_v31 = vld [vmem:[#allocation10 + $0x80] sm:$0xff] }
  0xd3   : > { %1786 = vmatprep.subr.mxu0 %v626_v15  ;;  %v609_v38 = vadd.f32 1.0, %v607_v37  ;;  %v984_v32 = vld [vmem:[#allocation10 + $0x8] sm:$0xff]  ;;  %v983_v35 = vld [vmem:[#allocation10] sm:$0xff]  ;;  %v2665_v37 = vld [vmem:[#allocation11 + $0x78] sm:$0xff] }
  0xd4   : > { %1787 = vmatpush3.msra.mxu0 %v626_v15  ;;  %v610_v39 = vmul.f32 %v608_v36, %v2627_v17  ;;  %v1006_v15 = vld [vmem:[#allocation10 + $0xb0] sm:$0xff] }
  0xd5   : > { %1788 = vmatprep.subr.mxu0 %v625_v24  ;;  %v611_v19 = vmul.f32 %v609_v38, %v2633_v20  ;;  %v916_v38 = vlaneseq }
  0xd6   : > { %1789 = vmatpush3.msra.mxu0 %v625_v24  ;;  %1761 = vmatprep.mubr.f32.mxu1 %v610_v39  ;;  %v617_v41 = vrot.slane %v610_v39, 7  ;;  %v806_v22 = vrot.slane %v610_v39, 1  ;;  %v988_v24 = vld [vmem:[#allocation10 + $0x28] sm:$0xff] }
  0xd7   : > { %1790 = vmatprep.subr.mxu0 %v624_v27  ;;  %1762 = vmatmul.mubr.f32.vlgmr.msra.gmra.mxu1 %v611_v19  ;;  %v613_v42 = vrot.slane %v611_v19, 7  ;;  %v807_v43 = vrot.slane %v611_v19, 1 }
  0xd8   : > { %1791 = vmatpush3.msra.mxu0 %v624_v27  ;;  %1800 = vmatpush3.msra.mxu1 %v2650_v51  ;;  %v823_v51 = vld [vmem:[#allocation7 + $0x148] sm:$0xff]  ;;  %v1002_v27 = vld [vmem:[#allocation10 + $0x90] sm:$0xff] }
  0xd9   : > { %1792 = vmatprep.subr.mxu0 %v623_v30  ;;  %1801 = vmatprep.subr.mxu1 %v828_v40  ;;  %v621_v45 = vsel %vm616_vm3, %v613_v42, %v617_v41  ;;  %v618_v46 = vsel %vm616_vm3, %v617_v41, %v613_v42  ;;  %v808_v47 = vsel %vm805_vm4, %v806_v22, %v807_v43  ;;  %v489_v41 = vld [vmem:[%s2762_s5] sm:$0x1] }
  0xda   : > { %1793 = vmatpush3.msra.mxu0 %v623_v30  ;;  %1802 = vmatpush3.msra.mxu1 %v828_v40  ;;  %v812_v61 = vsel %vm805_vm4, %v807_v43, %v806_v22  ;;  %v985_v30 = vld [vmem:[#allocation10 + $0x10] sm:$0xff]  ;;  %v917_v40 = vshrl.u32 %v916_v38, 7 }
  0xdb   : > { %1794 = vmatprep.subr.mxu0 %v622_v33  ;;  %1796 = vmatprep.mubr.f32.mxu0 %v621_v45 }
  0xdc   : > { %1795 = vmatpush3.msra.mxu0 %v622_v33  ;;  %1803 = vmatprep.subr.mxu1 %v827_v44  ;;  %v2662_v33 = vld [vmem:[#allocation10 + $0x178] sm:$0xff] }
  0xdd   : > { %1797 = vmatmul.mubr.f32.vlgmr.msra.gmra.mxu0 %v618_v46  ;;  %1804 = vmatpush3.msra.mxu1 %v827_v44  ;;  %v918_v44 = vsub.s32 0, %v917_v40 }
  0xde   : > { %1831 = vmatprep.mubr.f32.mxu1 %v808_v47  ;;  %1805 = vmatprep.subr.mxu1 %v826_v48  ;;  %v1541_v47 = vld [vmem:[%s2760_s3] ss:$0 sm:$0xff] }
  0xdf   : > { %1806 = vmatpush3.msra.mxu1 %v826_v48  ;;  %1834 = vmatprep.subr.mxu0 %v1015_v62 }
  0xe0   : > { %1807 = vmatprep.subr.mxu1 %v825_v49  ;;  %1835 = vmatpush3.msra.mxu0 %v1015_v62 }
  0xe1   : > { %1808 = vmatpush3.msra.mxu1 %v825_v49  ;;  %1836 = vmatprep.subr.mxu0 %v1014_v63 }
  0xe2   : > { %1809 = vmatprep.subr.mxu1 %v824_v50  ;;  %1837 = vmatpush3.msra.mxu0 %v1014_v63 }
  0xe3   : > { %1810 = vmatpush3.msra.mxu1 %v824_v50  ;;  %1838 = vmatprep.subr.mxu0 %v1013_v1 }
  0xe4   : > { %1811 = vmatprep.subr.mxu1 %v823_v51  ;;  %1839 = vmatpush3.msra.mxu0 %v1013_v1 }
  0xe5   : > { %1812 = vmatpush3.msra.mxu1 %v823_v51  ;;  %1840 = vmatprep.subr.mxu0 %v1012_v3 }
  0xe6   : > { %1813 = vmatprep.subr.mxu1 %v822_v52  ;;  %1841 = vmatpush3.msra.mxu0 %v1012_v3 }
  0xe7   : > { %1814 = vmatpush3.msra.mxu1 %v822_v52  ;;  %1842 = vmatprep.subr.mxu0 %v1011_v5 }
  0xe8   : > { %1815 = vmatprep.subr.mxu1 %v821_v53  ;;  %1843 = vmatpush3.msra.mxu0 %v1011_v5 }
  0xe9   : > { %1816 = vmatpush3.msra.mxu1 %v821_v53  ;;  %1844 = vmatprep.subr.mxu0 %v1010_v7 }
  0xea   : > { %1817 = vmatprep.subr.mxu1 %v820_v54  ;;  %1845 = vmatpush3.msra.mxu0 %v1010_v7 }
  0xeb   : > { %1818 = vmatpush3.msra.mxu1 %v820_v54  ;;  %1846 = vmatprep.subr.mxu0 %v1009_v9 }
  0xec   : > { %1819 = vmatprep.subr.mxu1 %v819_v55  ;;  %1847 = vmatpush3.msra.mxu0 %v1009_v9 }
  0xed   : > { %1820 = vmatpush3.msra.mxu1 %v819_v55  ;;  %1848 = vmatprep.subr.mxu0 %v1008_v11 }
  0xee   : > { %1821 = vmatprep.subr.mxu1 %v818_v56  ;;  %1849 = vmatpush3.msra.mxu0 %v1008_v11 }
  0xef   : > { %1822 = vmatpush3.msra.mxu1 %v818_v56  ;;  %1850 = vmatprep.subr.mxu0 %v1007_v13 }
  0xf0   : > { %1823 = vmatprep.subr.mxu1 %v817_v57  ;;  %1851 = vmatpush3.msra.mxu0 %v1007_v13 }
  0xf1   : > { %1824 = vmatpush3.msra.mxu1 %v817_v57  ;;  %1852 = vmatprep.subr.mxu0 %v1006_v15 }
  0xf2   : > { %1825 = vmatprep.subr.mxu1 %v816_v58  ;;  %1853 = vmatpush3.msra.mxu0 %v1006_v15 }
  0xf3   : > { %1826 = vmatpush3.msra.mxu1 %v816_v58  ;;  %1854 = vmatprep.subr.mxu0 %v1005_v18 }
  0xf4   : > { %1827 = vmatprep.subr.mxu1 %v815_v59  ;;  %1855 = vmatpush3.msra.mxu0 %v1005_v18 }
  0xf5   : > { %1828 = vmatpush3.msra.mxu1 %v815_v59  ;;  %1856 = vmatprep.subr.mxu0 %v1004_v23 }
  0xf6   : > { %1829 = vmatprep.subr.mxu1 %v814_v60  ;;  %1857 = vmatpush3.msra.mxu0 %v1004_v23 }
  0xf7   : > { %1830 = vmatpush3.msra.mxu1 %v814_v60  ;;  %1858 = vmatprep.subr.mxu0 %v1003_v25 }
  0xf8   : > { %1832 = vmatmul.mubr.f32.vlgmr.msra.gmra.mxu1 %v812_v61  ;;  %1869 = vmatprep.subr.mxu1 %v998_v0 }
  0xf9   : > { %1870 = vmatpush3.msra.mxu1 %v998_v0  ;;  %1859 = vmatpush3.msra.mxu0 %v1003_v25 }
  0xfa   : > { %1871 = vmatprep.subr.mxu1 %v997_v2  ;;  %1860 = vmatprep.subr.mxu0 %v1002_v27 }
  0xfb   : > { %1872 = vmatpush3.msra.mxu1 %v997_v2  ;;  %1861 = vmatpush3.msra.mxu0 %v1002_v27 }
  0xfc   : > { %1873 = vmatprep.subr.mxu1 %v996_v4  ;;  %1862 = vmatprep.subr.mxu0 %v1001_v29 }
  0xfd   : > { %1874 = vmatpush3.msra.mxu1 %v996_v4  ;;  %1863 = vmatpush3.msra.mxu0 %v1001_v29 }
  0xfe   : > { %1875 = vmatprep.subr.mxu1 %v995_v6  ;;  %1864 = vmatprep.subr.mxu0 %v1000_v31 }
  0xff   : > { %1876 = vmatpush3.msra.mxu1 %v995_v6  ;;  %1865 = vmatpush3.msra.mxu0 %v1000_v31 }
 0x100   : > { %1877 = vmatprep.subr.mxu1 %v994_v8  ;;  %1904 = vmatprep.subr.mxu0 %v2662_v33 }
 0x101   : > { %1878 = vmatpush3.msra.mxu1 %v994_v8 }
 0x102   : > { %1879 = vmatprep.subr.mxu1 %v993_v10 }
 0x103   : > { %1880 = vmatpush3.msra.mxu1 %v993_v10 }
 0x104   : > { %1881 = vmatprep.subr.mxu1 %v992_v12 }
 0x105   : > { %1882 = vmatpush3.msra.mxu1 %v992_v12 }
 0x106   : > { %1883 = vmatprep.subr.mxu1 %v991_v14 }
 0x107   : > { %1884 = vmatpush3.msra.mxu1 %v991_v14 }
 0x108   : > { %1885 = vmatprep.subr.mxu1 %v990_v16 }
 0x109   : > { %1886 = vmatpush3.msra.mxu1 %v990_v16 }
 0x10a   : > { %1887 = vmatprep.subr.mxu1 %v989_v21 }
 0x10b   : > { %1888 = vmatpush3.msra.mxu1 %v989_v21 }
 0x10c   : > { %1889 = vmatprep.subr.mxu1 %v988_v24 }
 0x10d   : > { %1890 = vmatpush3.msra.mxu1 %v988_v24 }
 0x10e   : > { %1891 = vmatprep.subr.mxu1 %v987_v26 }
 0x10f   : > { %1892 = vmatpush3.msra.mxu1 %v987_v26 }
 0x110   : > { %1893 = vmatprep.subr.mxu1 %v986_v28 }
 0x111   : > { %1894 = vmatpush3.msra.mxu1 %v986_v28 }
 0x112   : > { %1895 = vmatprep.subr.mxu1 %v985_v30 }
 0x113   : > { %1896 = vmatpush3.msra.mxu1 %v985_v30 }
 0x114   : > { %1897 = vmatprep.subr.mxu1 %v984_v32 }
 0x115   : > { %1898 = vmatpush3.msra.mxu1 %v984_v32 }
 0x116   : > { %1899 = vmatprep.subr.mxu1 %v983_v35 }
 0x117   : > { %1900 = vmatpush3.msra.mxu1 %v983_v35 }
 0x118   : > { %1939 = vmatprep.subr.mxu1 %v2665_v37 }
 0x17d   : > { %v556_v34 = vpop.f32.mrf.mxu0 }
 0x17e   : > { %v557_v43 = vadd.f32 %v556_v34, %v489_v41 }
 0x17f   : > { %v1728_v36 = vpop.f32.mrf.mxu0 }
 0x180   : > { %v919_v51 = vrot.slane %v557_v43, %v918_v44 }
 0x197   : > { %v1763_v39 = vpop.f32.mrf.mxu1 }
 0x199   : > { %v721_v22 = vpop.f32.mrf.mxu1 }
 0x19d   : > { %v1798_v19 = vpop.f32.mrf.mxu0 }
 0x19e   : > { %v802_v45 = vadd.f32 %v1798_v19, %v1763_v39 }
 0x19f   : > { %v796_v42 = vpop.f32.mrf.mxu0 }
 0x1a0   : > { %v797_v48 = vadd.f32 %v796_v42, %v721_v22 }
 0x1b8   : > { %v1833_v46 = vpop.f32.mrf.mxu1 }
 0x1b9   : > { %v906_v49 = vadd.f32 %v1833_v46, %v802_v45  ;;  %v1188_v45 = vld [vmem:[#allocation10 + $0x170] sm:$0xff] }
 0x1ba   : > { %v896_v50 = vpop.f32.mrf.mxu1 }
 0x1bb   : > { %v915_v52 = vadd.f32 %v1541_v47, %v906_v49  ;;  %v905_v53 = vadd.f32 %v896_v50, %v797_v48 }
 0x1bd   : > { %v921_v54 = vadd.f32 %v919_v51, %v915_v52  ;;  %v914_v55 = vadd.f32 %v1541_v47, %v905_v53  ;;  %v1187_v53 = vld [vmem:[#allocation10 + $0x168] sm:$0xff] }
 0x1bf   : > { %v923_v56 = vmul.f32 0.70710677, %v921_v54  ;;  %v920_v57 = vadd.f32 %v919_v51, %v914_v55  ;;  %v1186_v55 = vld [vmem:[#allocation10 + $0x160] sm:$0xff] }
 0x1c1   : > { %v925_v58 = vand.u32 2147483647, %v923_v56  ;;  %v922_v59 = vmul.f32 0.70710677, %v920_v57  ;;  %vm965_vm5 = vcmp.ge.f32.partialorder %v923_v56, 0.0  ;;  %v1185_v56 = vld [vmem:[#allocation10 + $0x158] sm:$0xff] }
 0x1c3   : > { %v927_v60 = vmul.f32 0.3275911, %v925_v58  ;;  %v924_v61 = vand.u32 2147483647, %v922_v59  ;;  %v953_v1 = vsub.f32 0.0, %v925_v58  ;;  %vm964_vm6 = vcmp.ge.f32.partialorder %v922_v59, 0.0 }
 0x1c4   : > { %v1287_v59 = vld [vmem:[#allocation11 + $0x58] sm:$0xff] }
 0x1c5   : > { %v929_v62 = vadd.f32 1.0, %v927_v60  ;;  %v926_v63 = vmul.f32 0.3275911, %v924_v61  ;;  %v952_v2 = vsub.f32 0.0, %v924_v61  ;;  %v955_v3 = vmul.f32 %v953_v1, %v925_v58  ;;  %v1184_v58 = vld [vmem:[#allocation10 + $0x150] sm:$0xff]  ;;  %v1183_v60 = vld [vmem:[#allocation10 + $0x148] sm:$0xff] }
 0x1c6   : > { %v1180_v1 = vld [vmem:[#allocation10 + $0x130] sm:$0xff] }
 0x1c7   : > { %2080 = vrcp.f32 %v929_v62  ;;  %v928_v0 = vadd.f32 1.0, %v926_v63  ;;  %v954_v5 = vmul.f32 %v952_v2, %v924_v61  ;;  %v958_v7 = vmul.f32 1.442695, %v955_v3  ;;  %v1182_v61 = vld [vmem:[#allocation10 + $0x140] sm:$0xff]  ;;  %v1285_v62 = vld [vmem:[#allocation11 + $0x48] sm:$0xff]  ;;  %v1181_v63 = vld [vmem:[#allocation10 + $0x138] sm:$0xff] }
 0x1c8   : > { %v1283_v2 = vld [vmem:[#allocation11 + $0x38] sm:$0xff]  ;;  %v1179_v3 = vld [vmem:[#allocation10 + $0x128] sm:$0xff] }
 0x1c9   : > { %2082 = vrcp.f32 %v928_v0  ;;  %v956_v10 = vmul.f32 1.442695, %v954_v5  ;;  %v1284_v0 = vld [vmem:[#allocation11 + $0x40] sm:$0xff] }
 0x1ca   : > { %2084 = vpow2.f32 %v958_v7  ;;  %v1178_v5 = vld [vmem:[#allocation10 + $0x120] sm:$0xff]  ;;  %v1177_v7 = vld [vmem:[#allocation10 + $0x118] sm:$0xff] }
 0x1cb   : > { %2086 = vpow2.f32 %v956_v10  ;;  %v1279_v10 = vld [vmem:[#allocation11 + $0x18] sm:$0xff] }
 0x1d4   : > { %v2081_v4 = vpop.eup %2080 }
 0x1d5   : > { %v935_v6 = vmul.f32 1.0614054, %v2081_v4 }
 0x1d6   : > { %v2083_v8 = vpop.eup %2082 }
 0x1d7   : > { %v937_v9 = vadd.f32 -1.4531521, %v935_v6  ;;  %v934_v11 = vmul.f32 1.0614054, %v2083_v8  ;;  %v2085_v29 = vpop.eup %2084  ;;  %v1281_v6 = vld [vmem:[#allocation11 + $0x28] sm:$0xff] }
 0x1d8   : > { %v2087_v34 = vpop.eup %2086 }
 0x1d9   : > { %v939_v12 = vmul.f32 %v2081_v4, %v937_v9  ;;  %v936_v13 = vadd.f32 -1.4531521, %v934_v11  ;;  %v1176_v9 = vld [vmem:[#allocation10 + $0x110] sm:$0xff]  ;;  %v1175_v11 = vld [vmem:[#allocation10 + $0x108] sm:$0xff] }
 0x1db   : > { %v941_v14 = vadd.f32 1.4214138, %v939_v12  ;;  %v938_v15 = vmul.f32 %v2083_v8, %v936_v13  ;;  %v1278_v12 = vld [vmem:[#allocation11 + $0x10] sm:$0xff]  ;;  %v1174_v13 = vld [vmem:[#allocation10 + $0x100] sm:$0xff] }
 0x1dd   : > { %v943_v16 = vmul.f32 %v2081_v4, %v941_v14  ;;  %v940_v18 = vadd.f32 1.4214138, %v938_v15  ;;  %v1277_v14 = vld [vmem:[#allocation11 + $0x8] sm:$0xff] }
 0x1df   : > { %v945_v21 = vadd.f32 -0.28449672, %v943_v16  ;;  %v942_v23 = vmul.f32 %v2083_v8, %v940_v18  ;;  %v1276_v16 = vld [vmem:[#allocation11] sm:$0xff] }
 0x1e1   : > { %v947_v24 = vmul.f32 %v2081_v4, %v945_v21  ;;  %v944_v25 = vadd.f32 -0.28449672, %v942_v23 }
 0x1e3   : > { %v949_v26 = vadd.f32 0.2548296, %v947_v24  ;;  %v946_v27 = vmul.f32 %v2083_v8, %v944_v25 }
 0x1e5   : > { %v951_v28 = vmul.f32 %v2081_v4, %v949_v26  ;;  %v948_v30 = vadd.f32 0.2548296, %v946_v27  ;;  %v1282_v4 = vld [vmem:[#allocation11 + $0x30] sm:$0xff]  ;;  %v1542_v27 = vld [vmem:[%s2764_s7] ss:$0 sm:$0xff] }
 0x1e7   : > { %v961_v31 = vmul.f32 %v2085_v29, %v951_v28  ;;  %v950_v32 = vmul.f32 %v2083_v8, %v948_v30  ;;  %v1280_v8 = vld [vmem:[#allocation11 + $0x20] sm:$0xff] }
 0x1e9   : > { %v963_v35 = vsub.f32 1.0, %v961_v31  ;;  %v960_v36 = vmul.f32 %v2087_v34, %v950_v32 }
 0x1eb   : > { %v967_v38 = vsub.f32 0.0, %v963_v35  ;;  %v962_v39 = vsub.f32 1.0, %v960_v36 }
 0x1ed   : > { %v969_v19 = vsel %vm965_vm5, %v963_v35, %v967_v38  ;;  %v966_v41 = vsub.f32 0.0, %v962_v39 }
 0x1ee   : > { %v971_v40 = vadd.f32 1.0, %v969_v19 }
 0x1ef   : > { %v968_v22 = vsel %vm964_vm6, %v962_v39, %v966_v41 }
 0x1f0   : > { %v2674_v42 = vmul.f32 %v971_v40, %v921_v54  ;;  %v970_v43 = vadd.f32 1.0, %v968_v22  ;;  %v1290_v54 = vld [vmem:[#allocation11 + $0x70] sm:$0xff] }
 0x1f2   : > { %v2676_v44 = vmul.f32 %v970_v43, %v920_v57  ;;  %v975_v46 = vrot.slane %v2674_v42, 7  ;;  %v1167_v49 = vrot.slane %v2674_v42, 1  ;;  %v1288_v57 = vld [vmem:[#allocation11 + $0x60] sm:$0xff] }
 0x1f4   : > { %1866 = vmatprep.mubr.f32.mxu0 %v2676_v44  ;;  %v978_v47 = vrot.slane %v2676_v44, 7  ;;  %v1166_v48 = vrot.slane %v2676_v44, 1 }
 0x1f5   : > { %1867 = vmatmul.mubr.f32.vlgmr.msra.gmra.mxu0 %v2674_v42 }
 0x1f6   : > { %1905 = vmatpush3.msra.mxu0 %v2662_v33  ;;  %v982_v50 = vsel %vm616_vm3, %v975_v46, %v978_v47  ;;  %v1168_v51 = vsel %vm805_vm4, %v1166_v48, %v1167_v49  ;;  %v979_v52 = vsel %vm616_vm3, %v978_v47, %v975_v46  ;;  %v1289_v33 = vld [vmem:[#allocation11 + $0x68] sm:$0xff]  ;;  %v1172_v15 = vsel %vm805_vm4, %v1167_v49, %v1166_v48 }
 0x1f7   : > { %1906 = vmatprep.subr.mxu0 %v1188_v45  ;;  %1901 = vmatprep.mubr.f32.mxu1 %v982_v50 }
 0x1f8   : > { %1907 = vmatpush3.msra.mxu0 %v1188_v45  ;;  %1936 = vmatprep.mubr.f32.mxu0 %v1168_v51 }
 0x1f9   : > { %1902 = vmatmul.mubr.f32.vlgmr.msra.gmra.mxu1 %v979_v52  ;;  %1908 = vmatprep.subr.mxu0 %v1187_v53 }
 0x1fa   : > { %1940 = vmatpush3.msra.mxu1 %v2665_v37  ;;  %1909 = vmatpush3.msra.mxu0 %v1187_v53  ;;  %v1286_v37 = vld [vmem:[#allocation11 + $0x50] sm:$0xff] }
 0x1fb   : > { %1941 = vmatprep.subr.mxu1 %v1290_v54  ;;  %1910 = vmatprep.subr.mxu0 %v1186_v55 }
 0x1fc   : > { %1942 = vmatpush3.msra.mxu1 %v1290_v54  ;;  %1911 = vmatpush3.msra.mxu0 %v1186_v55 }
 0x1fd   : > { %1943 = vmatprep.subr.mxu1 %v1289_v33  ;;  %1912 = vmatprep.subr.mxu0 %v1185_v56 }
 0x1fe   : > { %1944 = vmatpush3.msra.mxu1 %v1289_v33  ;;  %1913 = vmatpush3.msra.mxu0 %v1185_v56 }
 0x1ff   : > { %1945 = vmatprep.subr.mxu1 %v1288_v57  ;;  %1914 = vmatprep.subr.mxu0 %v1184_v58 }
 0x200   : > { %1946 = vmatpush3.msra.mxu1 %v1288_v57  ;;  %1915 = vmatpush3.msra.mxu0 %v1184_v58 }
 0x201   : > { %1947 = vmatprep.subr.mxu1 %v1287_v59  ;;  %1916 = vmatprep.subr.mxu0 %v1183_v60 }
 0x202   : > { %1948 = vmatpush3.msra.mxu1 %v1287_v59  ;;  %1917 = vmatpush3.msra.mxu0 %v1183_v60 }
 0x203   : > { %1949 = vmatprep.subr.mxu1 %v1286_v37  ;;  %1918 = vmatprep.subr.mxu0 %v1182_v61 }
 0x204   : > { %1950 = vmatpush3.msra.mxu1 %v1286_v37  ;;  %1919 = vmatpush3.msra.mxu0 %v1182_v61 }
 0x205   : > { %1951 = vmatprep.subr.mxu1 %v1285_v62  ;;  %1920 = vmatprep.subr.mxu0 %v1181_v63 }
 0x206   : > { %1952 = vmatpush3.msra.mxu1 %v1285_v62  ;;  %1921 = vmatpush3.msra.mxu0 %v1181_v63 }
 0x207   : > { %1953 = vmatprep.subr.mxu1 %v1284_v0  ;;  %1922 = vmatprep.subr.mxu0 %v1180_v1 }
 0x208   : > { %1954 = vmatpush3.msra.mxu1 %v1284_v0  ;;  %1923 = vmatpush3.msra.mxu0 %v1180_v1 }
 0x209   : > { %1955 = vmatprep.subr.mxu1 %v1283_v2  ;;  %1924 = vmatprep.subr.mxu0 %v1179_v3 }
 0x20a   : > { %1956 = vmatpush3.msra.mxu1 %v1283_v2  ;;  %1925 = vmatpush3.msra.mxu0 %v1179_v3 }
 0x20b   : > { %1957 = vmatprep.subr.mxu1 %v1282_v4  ;;  %1926 = vmatprep.subr.mxu0 %v1178_v5 }
 0x20c   : > { %1958 = vmatpush3.msra.mxu1 %v1282_v4  ;;  %1927 = vmatpush3.msra.mxu0 %v1178_v5 }
 0x20d   : > { %1959 = vmatprep.subr.mxu1 %v1281_v6  ;;  %1928 = vmatprep.subr.mxu0 %v1177_v7 }
 0x20e   : > { %1960 = vmatpush3.msra.mxu1 %v1281_v6  ;;  %1929 = vmatpush3.msra.mxu0 %v1177_v7 }
 0x20f   : > { %1961 = vmatprep.subr.mxu1 %v1280_v8  ;;  %1930 = vmatprep.subr.mxu0 %v1176_v9 }
 0x210   : > { %1962 = vmatpush3.msra.mxu1 %v1280_v8  ;;  %1931 = vmatpush3.msra.mxu0 %v1176_v9 }
 0x211   : > { %1963 = vmatprep.subr.mxu1 %v1279_v10  ;;  %1932 = vmatprep.subr.mxu0 %v1175_v11 }
 0x212   : > { %1964 = vmatpush3.msra.mxu1 %v1279_v10  ;;  %1933 = vmatpush3.msra.mxu0 %v1175_v11 }
 0x213   : > { %1965 = vmatprep.subr.mxu1 %v1278_v12  ;;  %1934 = vmatprep.subr.mxu0 %v1174_v13 }
 0x214   : > { %1966 = vmatpush3.msra.mxu1 %v1278_v12  ;;  %1935 = vmatpush3.msra.mxu0 %v1174_v13 }
 0x215   : > { %1967 = vmatprep.subr.mxu1 %v1277_v14  ;;  %1937 = vmatmul.mubr.f32.vlgmr.msra.gmra.mxu0 %v1172_v15 }
 0x216   : > { %1968 = vmatpush3.msra.mxu1 %v1277_v14  ;;  %1971 = vmatprep.mubr.f32.mxu1 %v2627_v17  ;;  %v1543_v17 = vld [vmem:[%s2766_s9] ss:$0 sm:$0xff] }
 0x217   : > { %1969 = vmatprep.subr.mxu1 %v1276_v16 }
 0x218   : > { %1970 = vmatpush3.msra.mxu1 %v1276_v16 }
 0x219   : > { %1972 = vmatmul.mubr.f32.vlgmr.msra.gmra.mxu1 %v2633_v20 }
 0x2b5   : > { %v1868_v18 = vpop.f32.mrf.mxu0 }
 0x2b7   : > { %v1082_v23 = vpop.f32.mrf.mxu0 }
 0x2b9   : > { %v1903_v21 = vpop.f32.mrf.mxu1 }
 0x2ba   : > { %v1163_v25 = vadd.f32 %v1903_v21, %v1868_v18 }
 0x2bb   : > { %v1157_v24 = vpop.f32.mrf.mxu1 }
 0x2bc   : > { %v1158_v28 = vadd.f32 %v1157_v24, %v1082_v23 }
 0x2d5   : > { %v1938_v26 = vpop.f32.mrf.mxu0 }
 0x2d6   : > { %v1266_v29 = vadd.f32 %v1938_v26, %v1163_v25 }
 0x2d7   : > { %v1256_v30 = vpop.f32.mrf.mxu0 }
 0x2d8   : > { %v1275_v31 = vadd.f32 %v1542_v27, %v1266_v29  ;;  %v1265_v20 = vadd.f32 %v1256_v30, %v1158_v28 }
 0x2d9   : > { %v1973_v32 = vpop.f32.mrf.mxu1 }
 0x2da   : > { %v1274_v34 = vadd.f32 %v1542_v27, %v1265_v20  ;;  %v1371_v35 = vadd.f32 %v1973_v32, %v1543_v17 }
 0x2db   : > { %v1365_v36 = vpop.f32.mrf.mxu1 }
 0x2dc   : > { %v1375_v38 = vadd.f32 %v1371_v35, %v1275_v31  ;;  %v1366_v39 = vadd.f32 %v1543_v17, %v1365_v36 }
 0x2de   : > { %1377 = vst [vmem:[%s469_s26 + $0x8] sm:$0xff] %v1375_v38  ;;  %v1374_v19 = vadd.f32 %v1366_v39, %v1274_v34 }
 0x2e0   : > { %1376 = vst [vmem:[%s469_s26] sm:$0xff] %v1374_v19 }
 0x2e1   : > { %2261 = shalt.err (!%p2258_p3)
}
 0x2e2   : > { %s2262_s12 = scalar_lea.hbm %s2714_s28, 256  ;;  %s2266_s18 = scalar_lea.hbm %s2767_s10, 512 }
 0x2e3   : > { %p2263_p8 = scmp.ne.s32.totalorder %s2714_s28, %s2262_s12  ;;  %p2267_p7 = scmp.lt.s32.totalorder %s2714_s28, %s2767_s10 }
 0x2e4   : > { %p2268_p1 = scmp.lt.s32.totalorder %s2266_s18, %s2262_s12 }
 0x2e5   : > { %p2264_p2 = pnand %p2263_p8, %p2810_p11 }
 0x2e6   : > { %p2269_p13 = por %p2268_p1, %p2267_p7 }
 0x2e7   : > { %p2265_p10 = pneg %p2264_p2 }
 0x2e9   : > { %p2270_p0 = pnand %p2269_p13, %p2265_p10 }
 0x2eb   : > { %2273 = shalt.err (!%p2270_p0)
}
 0x2ec   : > { %s2341_s30 = smov 128   ;;  %s2342_s11 = smov 8  }
 0x2ed   : > { %1994 = dma.vmem_to_hbm [thread:$0]  (%p2810_p11), %s2709_s6, 256, %s2714_s28, %s1379_s27, %s2341_s30, %s2341_s30, %s2342_s11  }
 0x2ee PF: > { %s2811_s23 = sld [smem:[#allocation21_spill]]  ;;  %s1407_s26 = sand.u32 1, %s2316_s13  }
 0x2ef   : > { %p2813_p12 = scmp.ge.s32.totalorder %s2328_s16, 2  ;;  %s1408_s8 = scalar_lea.sflag [#allocation4], %s1407_s26 }
 0x2f4   : > { %p2812_p5 = scmp.ne.s32.totalorder %s2811_s23, 0 }
 0x2f6   : > { %p2017_p4 = pnand %p2813_p12, %p2812_p5 }
 0x2f8   : > { %p2018_p6 = pneg %p2017_p4 }
 0x2fa   : > { %2311 = dma.done.wait (%p2018_p6), %s1408_s8, 256  }
 0x2fb   : > { %2313 = vsyncadd (%p2018_p6), %s1408_s8, 4294967040  ;;  %s2814_s16 = sld [smem:[#allocation22_spill]]  ;;  %s2817_s13 = smov %s2320_s14 }
 0x2fc   : > { %s2815_s22 = sld [smem:[#allocation20_spill]] }
 0x2fd   : > { %s2816_s15 = sld [smem:[#allocation23_spill]] }
 0x301   : > { %p28_p9 = scmp.ge.s32.totalorder %s2814_s16, 4  }
 0x302   : > { %s2818_s14 = smov %s2815_s22 }
 0x303   :  { %30 = sbr.rel (!%p28_p9) target bundleno = 15 (0xf), region = 138 }
 0x308   :  { %1413 = vsyncpa [#allocation3], 1 }
 0x309   :  { %1415 = vsyncpa [#allocation3 + $0x1], 1 }
 0x30a   :  { %1416 = vsyncpa [#allocation6], 1 }
 0x30b   :  { %1418 = vsyncpa [#allocation6 + $0x1], 1 }
 0x30c   :  { %1419 = vsyncpa [#allocation9], 1 }
 0x30d   :  { %1420 = vsyncpa [#allocation12], 1 }
 0x30e   :  { %1421 = vsyncpa [#allocation4], 1 }
 0x30f   :  { %1423 = vsyncpa [#allocation4 + $0x1], 1 }

</bundles_post_ra>
